<compile_context>
chip_gen: v7x
topology: tpu7x:2x2x1
jax: 0.10.0
libtpu: 0.0.40
codegen_flags: <defaults>
</compile_context>

<pallas_src>
import functools
import numpy as np

import jax
import jax.numpy as jnp
from jax.experimental import pallas as pl
from jax.experimental.pallas import tpu as pltpu


# ----------------------------------------------------------------------------
# Generation-aware tuning knobs
# ----------------------------------------------------------------------------

def _query_vmem_limit():
    # v7x: 64 MiB / TensorCore -> 48 MiB cap; v5e/v6e: 128 MiB -> ~96 MiB cap.
    try:
        cap = int(pltpu.get_tpu_info().vmem_capacity_bytes)
    except Exception:
        cap = 64 * 1024 * 1024
    return min((cap * 3) // 4, 100 * 1024 * 1024)


def _query_num_tensorcores():
    try:
        return max(1, int(getattr(jax.devices()[0], "num_cores", 1) or 1))
    except Exception:
        return 1


_VMEM_LIMIT = _query_vmem_limit()
_NUM_TC = _query_num_tensorcores()          # 2 on v7x, 1 on v5e/v6e


def _cp(n_grid_dims=1):
    return pltpu.CompilerParams(
        dimension_semantics=("parallel",) * n_grid_dims,
        vmem_limit_bytes=_VMEM_LIMIT)


def _pick_row_tile(m):
    """Largest row tile dividing m; require >=2 grid steps only when the chip
    has 2 TensorCores (v7x megacore) -- splitting tiny matmuls on a 1-TC chip
    only adds pipeline overhead."""
    for t in (1024, 512, 256, 128, 64, 32, 16, 8):
        if m % t == 0 and m // t >= _NUM_TC:
            return t
    return m


def _wspec(shape):
    """BlockSpec for a grid-invariant operand (weight / scale / bias): constant
    block index, so Pallas keeps it resident and never re-issues the DMA."""
    nd = len(shape)
    return pl.BlockSpec(shape, lambda *_: (0,) * nd)


# ----------------------------------------------------------------------------
# Fused linear-chain kernel:  act_n(...act_1((x@W1)*s1+b1)...)  in one launch
# ----------------------------------------------------------------------------

def _chain_kernel(*refs, acts):
    x_ref, o_ref = refs[0], refs[-1]
    h = x_ref[...]
    for li, act in enumerate(acts):
        w_ref, s_ref, b_ref = refs[1 + 3 * li: 4 + 3 * li]
        w = w_ref[...]
        if w.shape[0] <= 4:
            # Tiny contraction (e.g. xyz K=3): VPU broadcast MACs, skip the MXU.
            hf = h.astype(jnp.float32)
            wf = w.astype(jnp.float32)
            acc = hf[:, 0:1] * wf[0:1, :]
            for j in range(1, w.shape[0]):
                acc = acc + hf[:, j:j + 1] * wf[j:j + 1, :]
        else:
            acc = jnp.dot(h.astype(jnp.bfloat16), w.astype(jnp.bfloat16),
                          preferred_element_type=jnp.float32)
        h = acc * s_ref[...] + b_ref[...]
        if act == "relu":
            h = jnp.maximum(h, 0.0)
        elif act == "sigmoid2x":
            h = jax.nn.sigmoid(2.0 * h)
        elif act == "logsoftmax":
            m = jnp.max(h, axis=-1, keepdims=True)
            sh = h - m
            h = sh - jnp.log(jnp.sum(jnp.exp(sh), axis=-1, keepdims=True))
        # "none": fall through
    o_ref[...] = h.astype(o_ref.dtype)


@functools.partial(jax.jit, static_argnames=("acts", "out_dtype"))
def fused_chain(x, layers, acts, out_dtype=jnp.float32):
    """layers = [(w, scale, bias), ...]; all weights resident, one pallas_call."""
    M, K = x.shape
    n_out = layers[-1][0].shape[1]
    m_pad = max(8, ((M + 7) // 8) * 8)
    xp = x if m_pad == M else jnp.pad(x, ((0, m_pad - M), (0, 0)))
    tm = _pick_row_tile(m_pad)
    operands = [xp]
    in_specs = [pl.BlockSpec((tm, K), lambda i: (i, 0))]
    for (w, s, b) in layers:
        wk = w if w.shape[0] <= 4 else w.astype(jnp.bfloat16)
        n = w.shape[1]
        operands += [wk,
                     s.reshape(1, n).astype(jnp.float32),
                     b.reshape(1, n).astype(jnp.float32)]
        in_specs += [_wspec(tuple(w.shape)), _wspec((1, n)), _wspec((1, n))]
    out = pl.pallas_call(
        functools.partial(_chain_kernel, acts=acts),
        out_shape=jax.ShapeDtypeStruct((m_pad, n_out), out_dtype),
        grid_spec=pltpu.PrefetchScalarGridSpec(
            num_scalar_prefetch=0,
            grid=(m_pad // tm,),
            in_specs=in_specs,
            out_specs=pl.BlockSpec((tm, n_out), lambda i: (i, 0)),
        ),
        compiler_params=_cp(1),
    )(*operands)
    return out[:M]


# ----------------------------------------------------------------------------
# Fully-fused Point_Transformer_Last block (conv chain + 4 SA layers + pooled
# max of every branch), gridded over batch.  Only [B, 5*C] ever leaves VMEM.
# ----------------------------------------------------------------------------

def _pt_block_kernel(*refs):
    # refs = x, (c1w,c1s,c1b,c2w,c2s,c2b), 4x(wqv,v_b,tw,ts,tb), out
    x_ref, o_ref = refs[0], refs[-1]
    c1w, c1s, c1b, c2w, c2s, c2b = refs[1:7]
    sa_refs = refs[7:27]

    c = x_ref.shape[-1]
    x_in = x_ref[0].astype(jnp.float32)                        # [N, C]
    # pooled max of the raw input feature (feature_0 / feature_1 branch)
    o_ref[0, :, 4 * c:5 * c] = jnp.max(x_in, axis=0, keepdims=True)

    def lin_bn_relu(h, w_ref, s_ref, b_ref):
        a = jnp.dot(h.astype(jnp.bfloat16), w_ref[...],
                    preferred_element_type=jnp.float32)
        return jnp.maximum(a * s_ref[...] + b_ref[...], 0.0)

    h = lin_bn_relu(x_in, c1w, c1s, c1b)
    h = lin_bn_relu(h, c2w, c2s, c2b)

    for li in range(4):
        wqv, vb, tw, ts, tb = sa_refs[5 * li:5 * li + 5]
        qv = jnp.dot(h.astype(jnp.bfloat16), wqv[...],
                     preferred_element_type=jnp.float32)       # [N, C+128]
        v = qv[:, :c] + vb[...]                                # [N, C]
        q = qv[:, c:].astype(jnp.bfloat16)                     # [N, 128] (zero-padded)
        # energy = q q^T is symmetric (q_conv / k_conv share weights, no bias),
        # so att^T is built directly and the NxN transpose is avoided entirely.
        energy = jax.lax.dot_general(q, q, (((1,), (1,)), ((), ())),
                                     preferred_element_type=jnp.float32)  # [N, N]
        m = jnp.max(energy, axis=0, keepdims=True)             # == row max (symmetry)
        e_t = jnp.exp(energy - m)                              # e_t[j, i] = e[i, j]
        att_t = e_t * pl.reciprocal(jnp.sum(e_t, axis=0, keepdims=True),
                                    approx=True)               # att_t[j, i] = att[i, j]
        # torch's column renorm (att / (1e-9 + att.sum(dim=1))) applied to x_r:
        # an [N, C] scaling instead of another full NxN elementwise pass.
        col_norm = 1e-9 + jnp.sum(att_t, axis=-1, keepdims=True)   # [N, 1]
        x_r = jnp.dot(att_t.astype(jnp.bfloat16), v.astype(jnp.bfloat16),
                      preferred_element_type=jnp.float32)      # [N, C], no transpose
        x_r = x_r * pl.reciprocal(col_norm, approx=True)
        d = (h - x_r).astype(jnp.bfloat16)
        t = jnp.dot(d, tw[...], preferred_element_type=jnp.float32)
        h = h + jnp.maximum(t * ts[...] + tb[...], 0.0)        # trans+BN+ReLU, residual
        o_ref[0, :, li * c:(li + 1) * c] = jnp.max(h, axis=0, keepdims=True)


@jax.jit
def pt_block_fused(p, x):
    """Whole Point_Transformer_Last block in one pallas_call gridded over B.
    Returns pooled [B, 5*C] = [max(sa1)..max(sa4), max(input feature)]."""
    B, n, c = x.shape

    def vec(a):
        return a.reshape(1, c).astype(jnp.float32)

    operands = [x.astype(jnp.bfloat16),
                p["conv1_w"], vec(p["bn1"][0]), vec(p["bn1"][1]),
                p["conv2_w"], vec(p["bn2"][0]), vec(p["bn2"][1])]
    in_specs = [pl.BlockSpec((1, n, c), lambda b: (b, 0, 0)),
                _wspec((c, c)), _wspec((1, c)), _wspec((1, c)),
                _wspec((c, c)), _wspec((1, c)), _wspec((1, c))]
    for name in ("sa1", "sa2", "sa3", "sa4"):
        sa = p[name]
        cq = sa["wqv"].shape[1]
        operands += [sa["wqv"], vec(sa["v_b"]),
                     sa["trans_w"], vec(sa["trans_scale"]), vec(sa["trans_bias"])]
        in_specs += [_wspec((c, cq)), _wspec((1, c)),
                     _wspec((c, c)), _wspec((1, c)), _wspec((1, c))]

    out = pl.pallas_call(
        _pt_block_kernel,
        out_shape=jax.ShapeDtypeStruct((B, 1, 5 * c), jnp.float32),
        grid_spec=pltpu.PrefetchScalarGridSpec(
            num_scalar_prefetch=0,
            grid=(B,),
            in_specs=in_specs,
            out_specs=pl.BlockSpec((1, 1, 5 * c), lambda b: (b, 0, 0)),
        ),
        compiler_params=_cp(1),
    )(*operands)
    return out.reshape(B, 5 * c)


# ----------------------------------------------------------------------------
# Local_op: conv1 + conv2 + max over the 2 grouped neighbours, fused.
# Input is the grouped tensor as one lane-dense [B*S, 2*D] slab.
# ----------------------------------------------------------------------------

def _local_op_kernel(x_ref, w1_ref, s1_ref, b1_ref, w2_ref, s2_ref, b2_ref, o_ref):
    d = w1_ref.shape[0]

    def branch(x):
        h = jnp.dot(x.astype(jnp.bfloat16), w1_ref[...],
                    preferred_element_type=jnp.float32)
        h = jnp.maximum(h * s1_ref[...] + b1_ref[...], 0.0)
        h = jnp.dot(h.astype(jnp.bfloat16), w2_ref[...],
                    preferred_element_type=jnp.float32)
        return jnp.maximum(h * s2_ref[...] + b2_ref[...], 0.0)

    x = x_ref[...]
    # adaptive_max_pool1d over nsample=2 neighbours == one elementwise maximum.
    o_ref[...] = jnp.maximum(branch(x[:, :d]), branch(x[:, d:])).astype(o_ref.dtype)


@jax.jit
def local_op_fused(x, w1, s1, b1, w2, s2, b2):
    M, D2 = x.shape
    D = D2 // 2
    C1, C2 = w1.shape[1], w2.shape[1]
    tm = _pick_row_tile(M)
    return pl.pallas_call(
        _local_op_kernel,
        out_shape=jax.ShapeDtypeStruct((M, C2), jnp.bfloat16),
        grid_spec=pltpu.PrefetchScalarGridSpec(
            num_scalar_prefetch=0,
            grid=(M // tm,),
            in_specs=[pl.BlockSpec((tm, D2), lambda i: (i, 0)),
                      _wspec((D, C1)), _wspec((1, C1)), _wspec((1, C1)),
                      _wspec((C1, C2)), _wspec((1, C2)), _wspec((1, C2))],
            out_specs=pl.BlockSpec((tm, C2), lambda i: (i, 0)),
        ),
        compiler_params=_cp(1),
    )(x,
      w1.astype(jnp.bfloat16),
      s1.reshape(1, C1).astype(jnp.float32), b1.reshape(1, C1).astype(jnp.float32),
      w2.astype(jnp.bfloat16),
      s2.reshape(1, C2).astype(jnp.float32), b2.reshape(1, C2).astype(jnp.float32))


# ----------------------------------------------------------------------------
# Sampling / grouping (data-dependent; plain-JAX glue)
# ----------------------------------------------------------------------------

@functools.partial(jax.jit, static_argnums=(1,))
def farthest_point_sample(xyz, npoint):
    B, N, _ = xyz.shape
    distance0 = jnp.full((B, N), 1e10, dtype=jnp.float32)
    farthest0 = jnp.zeros((B,), dtype=jnp.int32)              # torch.randint(0, 1) == 0
    centroids0 = jnp.zeros((B, npoint), dtype=jnp.int32)

    def body(i, carry):
        centroids, distance, farthest = carry
        centroids = centroids.at[:, i].set(farthest)
        centroid = jnp.take_along_axis(xyz, farthest[:, None, None], axis=1)
        dist = jnp.sum((xyz - centroid) ** 2, axis=-1)
        distance = jnp.minimum(distance, dist)
        farthest = jnp.argmax(distance, axis=-1).astype(jnp.int32)
        return centroids, distance, farthest

    centroids, _, _ = jax.lax.fori_loop(0, npoint, body,
                                        (centroids0, distance0, farthest0))
    return centroids


def index_points(points, idx):
    return jax.vmap(lambda p, i: p[i])(points, idx)


def square_distance(src, dst):
    dist = -2.0 * jnp.einsum("bnc,bmc->bnm", src, dst)
    dist = dist + jnp.sum(src ** 2, axis=-1)[:, :, None]
    dist = dist + jnp.sum(dst ** 2, axis=-1)[:, None, :]
    return dist


def knn_point(nsample, xyz, new_xyz):
    sqrdists = square_distance(new_xyz, xyz)
    _, idx = jax.lax.top_k(-sqrdists, nsample)
    return idx


@functools.partial(jax.jit, static_argnums=(0, 1))
def sample_and_group(npoint, nsample, xyz, points):
    B, _, _ = xyz.shape
    S = npoint
    D = points.shape[-1]
    fps_idx = farthest_point_sample(xyz, npoint)
    new_xyz = index_points(xyz, fps_idx)                      # [B,S,3]
    new_points = index_points(points, fps_idx)                # [B,S,D]
    idx = knn_point(nsample, xyz, new_xyz)                    # [B,S,nsample]
    # grouped_xyz_norm is computed but unused in the reference; omitted.
    grouped_points = index_points(points, idx)                # [B,S,nsample,D]
    grouped_points_norm = grouped_points - new_points[:, :, None, :]
    rep = jnp.broadcast_to(new_points[:, :, None, :], (B, S, nsample, D))
    return new_xyz, jnp.concatenate([grouped_points_norm, rep], axis=-1)


# ----------------------------------------------------------------------------
# Module forwards (channel-last)
# ----------------------------------------------------------------------------

def local_op(p, grouped):
    B, S, s, D = grouped.shape                                # s == 2 neighbours
    # zero-copy reshape to a lane-dense [B*S, 2*D] slab; the kernel splits the
    # two 128-aligned halves in VMEM (no host slicing, one DMA per tile).
    x = grouped.reshape(B * S, s * D)
    h = local_op_fused(x, p["conv1_w"], *p["bn1"], p["conv2_w"], *p["bn2"])
    return h.reshape(B, S, h.shape[-1])


def spatial_attention_gate(w7, x):
    # SpatialAttention on a [B, C, 1, 1] tensor: mean/max over channels, then a
    # 7x7 conv (padding 3) on a 1x1 spatial map -> only the centre tap sees data.
    avg = jnp.mean(x, axis=1, keepdims=True)
    mx = jnp.max(x, axis=1, keepdims=True)
    y = w7[0, 0, 3, 3] * avg + w7[0, 1, 3, 3] * mx
    return jax.nn.sigmoid(y)                                  # [B, 1]


def channel_attention_gate(p, x):
    # avg_pool == max_pool == identity on 1x1 spatial -> sigmoid(2 * mlp(x)).
    h = p["fc1_w"].shape[1]
    c = p["fc2_w"].shape[1]
    return fused_chain(
        x,
        [(p["fc1_w"], jnp.ones((h,), jnp.float32), jnp.zeros((h,), jnp.float32)),
         (p["fc2_w"], jnp.ones((c,), jnp.float32), jnp.zeros((c,), jnp.float32))],
        acts=("relu", "sigmoid2x"))


def convlayer_forward(p, xyz):
    B, N, _ = xyz.shape
    h = fused_chain(xyz.reshape(B * N, 3),
                    [(p["conv1_w"], *p["bn1"]), (p["conv2_w"], *p["bn2"])],
                    acts=("relu", "relu"), out_dtype=jnp.bfloat16)
    points = h.reshape(B, N, 64)                              # bf16 activations
    new_xyz, grouped = sample_and_group(512, 2, xyz, points)
    feature_0 = local_op(p["gl0"], grouped)                   # [B,512,128] bf16
    new_xyz, grouped = sample_and_group(256, 2, new_xyz, feature_0)
    feature_1 = local_op(p["gl1"], grouped)                   # [B,256,256] bf16
    # torch: cat([sa1..sa4], C); cat([., feature], C); MaxPool2d((1, Np)).
    # max and concat commute over disjoint channel ranges, so only the pooled
    # [B, 5*C] vectors ever leave the fused PT kernels; the 1920-wide concat of
    # pooled vectors is plain (free) JAX.
    pooled1 = pt_block_fused(p["pt1"], feature_0)             # [B, 5*128]
    pooled2 = pt_block_fused(p["pt2"], feature_1)             # [B, 5*256]
    x = jnp.concatenate([pooled1, pooled2], axis=-1)          # [B, 1920]
    x = channel_attention_gate(p["ca"], x) * x
    x = spatial_attention_gate(p["sa_w"], x) * x
    return x                                                  # torch: [B,1920,1]


def latentfeature_forward(p, xs):
    outs = [convlayer_forward(p["convs"][i], xs[i]) for i in range(3)]
    # Conv1d(3,1,1)+BN+ReLU across the 3 stacked scales == a per-element weighted
    # sum of three [B,1920] vectors (pure VPU; no lane-sparse K=3 matmul).
    w = p["lat_w"].reshape(3).astype(jnp.float32)
    lat = outs[0] * w[0] + outs[1] * w[1] + outs[2] * w[2]
    lat = jnp.maximum(lat * p["lat_scale"][0] + p["lat_bias"][0], 0.0)
    return lat                                                # [B, 1920]


def pointcloud_cls_forward(params, xs):
    lat = latentfeature_forward(params["latent"], xs)         # see NOTE (tuple bug)
    k = params["fc4_w"].shape[1]
    # fc1/fc2/fc3 (Linear+BN+ReLU, dropout==identity) + fc4 + log_softmax fused.
    return fused_chain(
        lat,
        [params["fc1"], params["fc2"], params["fc3"],
         (params["fc4_w"], jnp.ones((k,), jnp.float32), params["fc4_b"])],
        acts=("relu", "relu", "relu", "logsoftmax"))


# ----------------------------------------------------------------------------
# Deterministic parameter construction (MXU weights stored in bf16)
# ----------------------------------------------------------------------------

class _KeyGen:
    def __init__(self, key):
        self._key = key

    def __call__(self):
        self._key, k = jax.random.split(self._key)
        return k


def _bf16(w):
    return w.astype(jnp.bfloat16)


def _make_w(kg, cin, cout):
    return jax.random.normal(kg(), (cin, cout), jnp.float32) / float(np.sqrt(cin))


def _make_b(kg, c):
    return 0.1 * jax.random.normal(kg(), (c,), jnp.float32)


def _make_bn(kg, c, eps=1e-5):
    gamma = 1.0 + 0.1 * jax.random.normal(kg(), (c,), jnp.float32)
    beta = 0.1 * jax.random.normal(kg(), (c,), jnp.float32)
    mean = 0.05 * jax.random.normal(kg(), (c,), jnp.float32)
    var = jnp.ones((c,), jnp.float32)
    scale = gamma / jnp.sqrt(var + eps)
    return scale, beta - mean * scale


def _make_local_op(kg, cin, cout):
    return dict(conv1_w=_bf16(_make_w(kg, cin, cout)), bn1=_make_bn(kg, cout),
                conv2_w=_bf16(_make_w(kg, cout, cout)), bn2=_make_bn(kg, cout))


def _make_sa_layer(kg, c):
    q_w = _make_w(kg, c, c // 4)                  # q_conv and k_conv share weights
    q_w = jnp.pad(q_w, ((0, 0), (0, 128 - c // 4)))   # lane-pad q to a full 128 tile
    v_w = _make_w(kg, c, c)
    v_b = _make_b(kg, c)
    t_w = _make_w(kg, c, c)
    t_b = _make_b(kg, c)
    bn_s, bn_b = _make_bn(kg, c)
    return dict(wqv=_bf16(jnp.concatenate([v_w, q_w], axis=1)),   # [C, C + 128]
                v_b=v_b, trans_w=_bf16(t_w),
                trans_scale=bn_s, trans_bias=t_b * bn_s + bn_b)


def _make_pt_last(kg, c):
    return dict(conv1_w=_bf16(_make_w(kg, c, c)), bn1=_make_bn(kg, c),
                conv2_w=_bf16(_make_w(kg, c, c)), bn2=_make_bn(kg, c),
                sa1=_make_sa_layer(kg, c), sa2=_make_sa_layer(kg, c),
                sa3=_make_sa_layer(kg, c), sa4=_make_sa_layer(kg, c))


def _make_convlayer(kg):
    return dict(
        conv1_w=_make_w(kg, 3, 64), bn1=_make_bn(kg, 64),     # K=3 -> VPU path (f32)
        conv2_w=_bf16(_make_w(kg, 64, 64)), bn2=_make_bn(kg, 64),
        gl0=_make_local_op(kg, 128, 128), gl1=_make_local_op(kg, 256, 256),
        pt1=_make_pt_last(kg, 128), pt2=_make_pt_last(kg, 256),
        ca=dict(fc1_w=_bf16(_make_w(kg, 1920, 1920 // 16)),
                fc2_w=_bf16(_make_w(kg, 1920 // 16, 1920))),
        sa_w=0.5 * jax.random.normal(kg(), (1, 2, 7, 7), jnp.float32),
    )


def _make_latent(kg):
    convs = [_make_convlayer(kg) for _ in range(3)]           # each_scales_size == 1
    lat_w = _make_w(kg, 3, 1)
    lat_b = _make_b(kg, 1)
    bn_s, bn_b = _make_bn(kg, 1)
    return dict(convs=convs, lat_w=lat_w,
                lat_scale=bn_s, lat_bias=lat_b * bn_s + bn_b)


def make_pointcloud_cls_params(key, k=40):
    kg = _KeyGen(key)
    latent = _make_latent(kg)

    def lin_bn(cin, cout):
        w = _make_w(kg, cin, cout)
        b = _make_b(kg, cout)
        s, bb = _make_bn(kg, cout)
        return (_bf16(w), s, b * s + bb)

    return dict(latent=latent,
                fc1=lin_bn(1920, 1024), fc2=lin_bn(1024, 512), fc3=lin_bn(512, 256),
                fc4_w=_bf16(_make_w(kg, 256, k)), fc4_b=_make_b(kg, k))


# ----------------------------------------------------------------------------
# Main
# ----------------------------------------------------------------------------

if __name__ == "__main__":
    num_scales = 3
    point_scales_list = [256, 128, 64]      # small input point clouds (B, N_i, 3)
    k = 40
    B = 2

    params = make_pointcloud_cls_params(jax.random.PRNGKey(42), k=k)

    keys = jax.random.split(jax.random.PRNGKey(0), num_scales)
    xs = [jax.random.normal(keys[i], (B, point_scales_list[i], 3), jnp.float32)
          for i in range(num_scales)]

    logp = pointcloud_cls_forward(params, xs)
    logp = jax.block_until_ready(logp)

    assert logp.shape == (B, k), logp.shape
    assert bool(jnp.all(jnp.isfinite(logp)))
    # rows of exp(log_softmax) must sum to ~1
    assert bool(jnp.allclose(jnp.sum(jnp.exp(logp), axis=1), 1.0, atol=1e-3))
    print("KERNEL_OK")
</pallas_src>

<mosaic_0001>
module attributes {stable_mosaic.version = 11 : i64} {
  func.func @_chain_kernel(%arg0: i32, %arg1: memref<512x3xf32, #tpu.memory_space<vmem>>, %arg2: memref<3x64xf32, #tpu.memory_space<vmem>>, %arg3: memref<1x64xf32, #tpu.memory_space<vmem>>, %arg4: memref<1x64xf32, #tpu.memory_space<vmem>>, %arg5: memref<64x64xbf16, #tpu.memory_space<vmem>>, %arg6: memref<1x64xf32, #tpu.memory_space<vmem>>, %arg7: memref<1x64xf32, #tpu.memory_space<vmem>>, %arg8: memref<512x64xbf16, #tpu.memory_space<vmem>>) attributes {dimension_semantics = [#tpu.dimension_semantics<parallel>], iteration_bounds = array<i64: 1>, scalar_prefetch = 0 : i64, scratch_operands = 0 : i64, tpu.core_type = #tpu.core_type<tc>, window_params = [{transform_indices = @transform_0, window_bounds = array<i64: 512, 3>}, {pipeline_mode = #tpu.pipeline_mode<synchronous>, transform_indices = @transform_1, window_bounds = array<i64: 3, 64>}, {pipeline_mode = #tpu.pipeline_mode<synchronous>, transform_indices = @transform_2, window_bounds = array<i64: 1, 64>}, {pipeline_mode = #tpu.pipeline_mode<synchronous>, transform_indices = @transform_3, window_bounds = array<i64: 1, 64>}, {pipeline_mode = #tpu.pipeline_mode<synchronous>, transform_indices = @transform_4, window_bounds = array<i64: 64, 64>}, {pipeline_mode = #tpu.pipeline_mode<synchronous>, transform_indices = @transform_5, window_bounds = array<i64: 1, 64>}, {pipeline_mode = #tpu.pipeline_mode<synchronous>, transform_indices = @transform_6, window_bounds = array<i64: 1, 64>}, {transform_indices = @transform_7, window_bounds = array<i64: 512, 64>}]} {
    %c0 = arith.constant 0 : index
    %c0_0 = arith.constant 0 : index
    %0 = vector.load %arg1[%c0, %c0_0] : memref<512x3xf32, #tpu.memory_space<vmem>>, vector<512x3xf32>
    %c0_1 = arith.constant 0 : index
    %c0_2 = arith.constant 0 : index
    %1 = vector.load %arg2[%c0_1, %c0_2] : memref<3x64xf32, #tpu.memory_space<vmem>>, vector<3x64xf32>
    %2 = vector.extract_strided_slice %0 {offsets = [0, 0], sizes = [512, 1], strides = [1, 1]} : vector<512x3xf32> to vector<512x1xf32>
    %3 = vector.extract_strided_slice %1 {offsets = [0, 0], sizes = [1, 64], strides = [1, 1]} : vector<3x64xf32> to vector<1x64xf32>
    %4 = vector.broadcast %2 : vector<512x1xf32> to vector<512x64xf32>
    %5 = vector.broadcast %3 : vector<1x64xf32> to vector<512x64xf32>
    %6 = arith.mulf %4, %5 : vector<512x64xf32>
    %7 = vector.extract_strided_slice %0 {offsets = [0, 1], sizes = [512, 1], strides = [1, 1]} : vector<512x3xf32> to vector<512x1xf32>
    %8 = vector.extract_strided_slice %1 {offsets = [1, 0], sizes = [1, 64], strides = [1, 1]} : vector<3x64xf32> to vector<1x64xf32>
    %9 = vector.broadcast %7 : vector<512x1xf32> to vector<512x64xf32>
    %10 = vector.broadcast %8 : vector<1x64xf32> to vector<512x64xf32>
    %11 = arith.mulf %9, %10 : vector<512x64xf32>
    %12 = arith.addf %6, %11 : vector<512x64xf32>
    %13 = vector.extract_strided_slice %0 {offsets = [0, 2], sizes = [512, 1], strides = [1, 1]} : vector<512x3xf32> to vector<512x1xf32>
    %14 = vector.extract_strided_slice %1 {offsets = [2, 0], sizes = [1, 64], strides = [1, 1]} : vector<3x64xf32> to vector<1x64xf32>
    %15 = vector.broadcast %13 : vector<512x1xf32> to vector<512x64xf32>
    %16 = vector.broadcast %14 : vector<1x64xf32> to vector<512x64xf32>
    %17 = arith.mulf %15, %16 : vector<512x64xf32>
    %18 = arith.addf %12, %17 : vector<512x64xf32>
    %c0_3 = arith.constant 0 : index
    %c0_4 = arith.constant 0 : index
    %19 = vector.load %arg3[%c0_3, %c0_4] : memref<1x64xf32, #tpu.memory_space<vmem>>, vector<1x64xf32>
    %20 = vector.broadcast %19 : vector<1x64xf32> to vector<512x64xf32>
    %21 = arith.mulf %18, %20 : vector<512x64xf32>
    %c0_5 = arith.constant 0 : index
    %c0_6 = arith.constant 0 : index
    %22 = vector.load %arg4[%c0_5, %c0_6] : memref<1x64xf32, #tpu.memory_space<vmem>>, vector<1x64xf32>
    %23 = vector.broadcast %22 : vector<1x64xf32> to vector<512x64xf32>
    %24 = arith.addf %21, %23 : vector<512x64xf32>
    %cst = arith.constant 0.000000e+00 : f32
    %25 = vector.broadcast %cst : f32 to vector<512x64xf32>
    %26 = arith.maximumf %24, %25 : vector<512x64xf32>
    %c0_7 = arith.constant 0 : index
    %c0_8 = arith.constant 0 : index
    %27 = vector.load %arg5[%c0_7, %c0_8] : memref<64x64xbf16, #tpu.memory_space<vmem>>, vector<64x64xbf16>
    %28 = arith.truncf %26 : vector<512x64xf32> to vector<512x64xbf16>
    %cst_9 = arith.constant dense<0.000000e+00> : vector<512x64xf32>
    %29 = tpu.matmul %28, %27, %cst_9 {dimension_numbers = #tpu.dot_dimension_numbers<[1], [0], [0], [1], [0, 0, 1, 1], [], []>} : vector<512x64xbf16>, vector<64x64xbf16>, vector<512x64xf32> -> vector<512x64xf32>
    %c0_10 = arith.constant 0 : index
    %c0_11 = arith.constant 0 : index
    %30 = vector.load %arg6[%c0_10, %c0_11] : memref<1x64xf32, #tpu.memory_space<vmem>>, vector<1x64xf32>
    %31 = vector.broadcast %30 : vector<1x64xf32> to vector<512x64xf32>
    %32 = arith.mulf %29, %31 : vector<512x64xf32>
    %c0_12 = arith.constant 0 : index
    %c0_13 = arith.constant 0 : index
    %33 = vector.load %arg7[%c0_12, %c0_13] : memref<1x64xf32, #tpu.memory_space<vmem>>, vector<1x64xf32>
    %34 = vector.broadcast %33 : vector<1x64xf32> to vector<512x64xf32>
    %35 = arith.addf %32, %34 : vector<512x64xf32>
    %cst_14 = arith.constant 0.000000e+00 : f32
    %36 = vector.broadcast %cst_14 : f32 to vector<512x64xf32>
    %37 = arith.maximumf %35, %36 : vector<512x64xf32>
    %38 = arith.truncf %37 : vector<512x64xf32> to vector<512x64xbf16>
    %c0_15 = arith.constant 0 : index
    %c0_16 = arith.constant 0 : index
    %39 = vector.load %arg8[%c0_15, %c0_16] : memref<512x64xbf16, #tpu.memory_space<vmem>>, vector<512x64xbf16>
    tpu.vector_store %arg8[%c0_15, %c0_16], %38 {strides = array<i32>} : memref<512x64xbf16, #tpu.memory_space<vmem>>, vector<512x64xbf16>,
    return
  }
  func.func @transform_0(%arg0: i32) -> (i32, i32) {
    %c0_i32 = arith.constant 0 : i32
    %c0_i32_0 = arith.constant 0 : i32
    return %arg0, %c0_i32 : i32, i32
  }
  func.func @transform_1(%arg0: i32) -> (i32, i32) {
    %c0_i32 = arith.constant 0 : i32
    %c0_i32_0 = arith.constant 0 : i32
    %c0_i32_1 = arith.constant 0 : i32
    return %c0_i32, %c0_i32_0 : i32, i32
  }
  func.func @transform_2(%arg0: i32) -> (i32, i32) {
    %c0_i32 = arith.constant 0 : i32
    %c0_i32_0 = arith.constant 0 : i32
    %c0_i32_1 = arith.constant 0 : i32
    return %c0_i32, %c0_i32_0 : i32, i32
  }
  func.func @transform_3(%arg0: i32) -> (i32, i32) {
    %c0_i32 = arith.constant 0 : i32
    %c0_i32_0 = arith.constant 0 : i32
    %c0_i32_1 = arith.constant 0 : i32
    return %c0_i32, %c0_i32_0 : i32, i32
  }
  func.func @transform_4(%arg0: i32) -> (i32, i32) {
    %c0_i32 = arith.constant 0 : i32
    %c0_i32_0 = arith.constant 0 : i32
    %c0_i32_1 = arith.constant 0 : i32
    return %c0_i32, %c0_i32_0 : i32, i32
  }
  func.func @transform_5(%arg0: i32) -> (i32, i32) {
    %c0_i32 = arith.constant 0 : i32
    %c0_i32_0 = arith.constant 0 : i32
    %c0_i32_1 = arith.constant 0 : i32
    return %c0_i32, %c0_i32_0 : i32, i32
  }
  func.func @transform_6(%arg0: i32) -> (i32, i32) {
    %c0_i32 = arith.constant 0 : i32
    %c0_i32_0 = arith.constant 0 : i32
    %c0_i32_1 = arith.constant 0 : i32
    return %c0_i32, %c0_i32_0 : i32, i32
  }
  func.func @transform_7(%arg0: i32) -> (i32, i32) {
    %c0_i32 = arith.constant 0 : i32
    %c0_i32_0 = arith.constant 0 : i32
    return %arg0, %c0_i32 : i32, i32
  }
}

</mosaic_0001>

<bundles_post_ra>
// kernel: fused_chain.1
= control target key start
LH: loop header
LB: loop body
LE: loop exit
PB: predicated region body
PF: predicated region fallthrough
CT: control target
= control target key end

     0   :  { %v2760_v0 = vmov 0   ;;  %vm1526_vm0 = vcmask 523264   ;;  %vm2374_vm1 = vcmask 519168   ;;  %s4635_s0 = inlined_call_operand.vmem [shape: f32[512,3], index: 0, kind: input, shape index: {}]   ;;  %s4636_s4 = inlined_call_operand.vmem [shape: bf16[64,64], index: 4, kind: input, shape index: {}]   ;;  %s4637_s1 = inlined_call_operand.vmem [shape: f32[3,64], index: 1, kind: input, shape index: {}]   ;;  %s4638_s2 = inlined_call_operand.vmem [shape: f32[1,64], index: 2, kind: input, shape index: {}]   ;;  %s4639_s3 = inlined_call_operand.vmem [shape: f32[1,64], index: 3, kind: input, shape index: {}]   ;;  %s4640_s5 = inlined_call_operand.vmem [shape: f32[1,64], index: 5, kind: input, shape index: {}]   ;;  %s4641_s6 = inlined_call_operand.vmem [shape: f32[1,64], index: 6, kind: input, shape index: {}]   ;;  %s4642_s7 = inlined_call_operand.vmem [shape: bf16[512,64], index: 7, kind: output, shape index: {}]  }
   0x1   :  { %2731 = vset.pattern.permute.xlu1 %v2760_v0  ;;  %2730 = vset.pattern.permute.xlu0 %v2760_v0  ;;  %v2806_v1 = vld [vmem:[%s4635_s0 + $0x10] sm:$0xff]  ;;  %v2811_v2 = vld [vmem:[%s4635_s0] sm:$0xff]  ;;  %v2818_v3 = vld [vmem:[%s4635_s0 + $0x18] sm:$0xff] }
   0x2   :  { %104 = vperm.xlu1 %2731, %v2806_v1   ;;  %94 = vperm.xlu0 %2730, %v2811_v2   ;;  %v2823_v4 = vld [vmem:[%s4635_s0 + $0x8] sm:$0xff]  ;;  %v2835_v6 = vld [vmem:[%s4635_s0 + $0x20] sm:$0xff]  ;;  %v2842_v7 = vld [vmem:[%s4635_s0 + $0x38] sm:$0xff] }
   0x3   :  { %v2830_v5 = vld [vmem:[%s4635_s0 + $0x28] sm:$0xff]  ;;  %v2847_v8 = vld [vmem:[%s4635_s0 + $0x30] sm:$0xff]  ;;  %v2859_v10 = vld [vmem:[%s4635_s0 + $0x40] sm:$0xff] }
   0x4   :  { %v2854_v9 = vld [vmem:[%s4635_s0 + $0x48] sm:$0xff]  ;;  %v2866_v11 = vld [vmem:[%s4635_s0 + $0x58] sm:$0xff]  ;;  %v2871_v12 = vld [vmem:[%s4635_s0 + $0x50] sm:$0xff] }
   0x5   :  { %v2878_v13 = vld [vmem:[%s4635_s0 + $0x68] sm:$0xff]  ;;  %v2883_v14 = vld [vmem:[%s4635_s0 + $0x60] sm:$0xff]  ;;  %v2890_v15 = vld [vmem:[%s4635_s0 + $0x78] sm:$0xff] }
   0x6   :  { %109 = vperm.xlu1 %2731, %v2818_v3   ;;  %99 = vperm.xlu0 %2730, %v2823_v4   ;;  %v2895_v16 = vld [vmem:[%s4635_s0 + $0x70] sm:$0xff]  ;;  %v2902_v17 = vld [vmem:[%s4635_s0 + $0x88] sm:$0xff]  ;;  %v2907_v18 = vld [vmem:[%s4635_s0 + $0x80] sm:$0xff] }
   0x7   :  { %v2914_v19 = vld [vmem:[%s4635_s0 + $0x98] sm:$0xff]  ;;  %v2919_v20 = vld [vmem:[%s4635_s0 + $0x90] sm:$0xff]  ;;  %v2926_v21 = vld [vmem:[%s4635_s0 + $0xa8] sm:$0xff] }
   0x8   :  { %v2931_v22 = vld [vmem:[%s4635_s0 + $0xa0] sm:$0xff]  ;;  %v2938_v23 = vld [vmem:[%s4635_s0 + $0xb8] sm:$0xff]  ;;  %v2943_v24 = vld [vmem:[%s4635_s0 + $0xb0] sm:$0xff] }
   0x9   :  { %v2950_v25 = vld [vmem:[%s4635_s0 + $0xc8] sm:$0xff]  ;;  %v2955_v26 = vld [vmem:[%s4635_s0 + $0xc0] sm:$0xff]  ;;  %v2962_v27 = vld [vmem:[%s4635_s0 + $0xd8] sm:$0xff] }
   0xa   :  { %119 = vperm.xlu1 %2731, %v2830_v5   ;;  %114 = vperm.xlu0 %2730, %v2835_v6   ;;  %4665 = vst [vmem:[#allocation2_spill] sm:$0xff] %v2955_v26  ;;  %4666 = vst [vmem:[#allocation3_spill] sm:$0xff] %v2962_v27  ;;  %v2967_v28 = vld [vmem:[%s4635_s0 + $0xd0] sm:$0xff]  ;;  %v2974_v29 = vld [vmem:[%s4635_s0 + $0xe8] sm:$0xff] }
   0xb   :  { %v2979_v30 = vld [vmem:[%s4635_s0 + $0xe0] sm:$0xff]  ;;  %v2986_v31 = vld [vmem:[%s4635_s0 + $0xf8] sm:$0xff]  ;;  %v2991_v32 = vld [vmem:[%s4635_s0 + $0xf0] sm:$0xff] }
   0xc   :  { %v2998_v33 = vld [vmem:[%s4635_s0 + $0x108] sm:$0xff]  ;;  %v3003_v34 = vld [vmem:[%s4635_s0 + $0x100] sm:$0xff]  ;;  %v3010_v35 = vld [vmem:[%s4635_s0 + $0x118] sm:$0xff] }
   0xd   :  { %v3015_v36 = vld [vmem:[%s4635_s0 + $0x110] sm:$0xff]  ;;  %v3022_v37 = vld [vmem:[%s4635_s0 + $0x128] sm:$0xff]  ;;  %v3027_v38 = vld [vmem:[%s4635_s0 + $0x120] sm:$0xff] }
   0xe   :  { %129 = vperm.xlu1 %2731, %v2842_v7   ;;  %124 = vperm.xlu0 %2730, %v2847_v8   ;;  %v3034_v39 = vld [vmem:[%s4635_s0 + $0x138] sm:$0xff]  ;;  %v3039_v40 = vld [vmem:[%s4635_s0 + $0x130] sm:$0xff]  ;;  %v3046_v41 = vld [vmem:[%s4635_s0 + $0x148] sm:$0xff] }
   0xf   :  { %v3051_v42 = vld [vmem:[%s4635_s0 + $0x140] sm:$0xff]  ;;  %v3058_v43 = vld [vmem:[%s4635_s0 + $0x158] sm:$0xff]  ;;  %v3063_v44 = vld [vmem:[%s4635_s0 + $0x150] sm:$0xff] }
  0x10   :  { %v3070_v45 = vld [vmem:[%s4635_s0 + $0x168] sm:$0xff]  ;;  %v3075_v46 = vld [vmem:[%s4635_s0 + $0x160] sm:$0xff]  ;;  %v3082_v47 = vld [vmem:[%s4635_s0 + $0x178] sm:$0xff] }
  0x11   :  { %v3087_v48 = vld [vmem:[%s4635_s0 + $0x170] sm:$0xff]  ;;  %v3094_v49 = vld [vmem:[%s4635_s0 + $0x188] sm:$0xff]  ;;  %v3099_v50 = vld [vmem:[%s4635_s0 + $0x180] sm:$0xff] }
  0x12   :  { %139 = vperm.xlu1 %2731, %v2854_v9   ;;  %134 = vperm.xlu0 %2730, %v2859_v10   ;;  %v3106_v51 = vld [vmem:[%s4635_s0 + $0x198] sm:$0xff]  ;;  %v3111_v52 = vld [vmem:[%s4635_s0 + $0x190] sm:$0xff]  ;;  %v3118_v53 = vld [vmem:[%s4635_s0 + $0x1a8] sm:$0xff] }
  0x13   :  { %4667 = vst [vmem:[#allocation4_spill] sm:$0xff] %v3118_v53  ;;  %v3123_v54 = vld [vmem:[%s4635_s0 + $0x1a0] sm:$0xff]  ;;  %v3130_v55 = vld [vmem:[%s4635_s0 + $0x1b8] sm:$0xff]  ;;  %v3135_v56 = vld [vmem:[%s4635_s0 + $0x1b0] sm:$0xff] }
  0x14   :  { %4668 = vst [vmem:[#allocation5_spill] sm:$0xff] %v3135_v56  ;;  %v3142_v57 = vld [vmem:[%s4635_s0 + $0x1c8] sm:$0xff]  ;;  %v3147_v58 = vld [vmem:[%s4635_s0 + $0x1c0] sm:$0xff]  ;;  %v3154_v59 = vld [vmem:[%s4635_s0 + $0x1d8] sm:$0xff] }
  0x15   :  { %4669 = vst [vmem:[#allocation6_spill] sm:$0xff] %v3142_v57  ;;  %v3159_v60 = vld [vmem:[%s4635_s0 + $0x1d0] sm:$0xff]  ;;  %v3166_v61 = vld [vmem:[%s4635_s0 + $0x1e8] sm:$0xff]  ;;  %v3171_v62 = vld [vmem:[%s4635_s0 + $0x1e0] sm:$0xff] }
  0x16   :  { %149 = vperm.xlu1 %2731, %v2866_v11   ;;  %144 = vperm.xlu0 %2730, %v2871_v12   ;;  %4670 = vst [vmem:[#allocation7_spill] sm:$0xff] %v3159_v60  ;;  %4671 = vst [vmem:[#allocation8_spill] sm:$0xff] %v3166_v61  ;;  %v3178_v63 = vld [vmem:[%s4635_s0 + $0x1f8] sm:$0xff]  ;;  %v3183_v0 = vld [vmem:[%s4635_s0 + $0x1f0] sm:$0xff] }
  0x17   :  { %4672 = vst [vmem:[#allocation9_spill] sm:$0xff] %v3171_v62  ;;  %4673 = vst [vmem:[#allocation10_spill] sm:$0xff] %v3183_v0 }
  0x1a   :  { %159 = vperm.xlu1 %2731, %v2878_v13   ;;  %154 = vperm.xlu0 %2730, %v2883_v14  }
  0x1e   :  { %169 = vperm.xlu1 %2731, %v2890_v15   ;;  %164 = vperm.xlu0 %2730, %v2895_v16  }
  0x22   :  { %179 = vperm.xlu1 %2731, %v2902_v17   ;;  %174 = vperm.xlu0 %2730, %v2907_v18  }
  0x26   :  { %189 = vperm.xlu1 %2731, %v2914_v19   ;;  %184 = vperm.xlu0 %2730, %v2919_v20  }
  0x2a   :  { %199 = vperm.xlu1 %2731, %v2926_v21   ;;  %194 = vperm.xlu0 %2730, %v2931_v22  }
  0x2e   :  { %209 = vperm.xlu1 %2731, %v2938_v23   ;;  %204 = vperm.xlu0 %2730, %v2943_v24  }
  0x32   :  { %219 = vperm.xlu1 %2731, %v2950_v25   ;;  %214 = vperm.xlu0 %2730, %v2955_v26  }
  0x36   :  { %229 = vperm.xlu1 %2731, %v2962_v27   ;;  %224 = vperm.xlu0 %2730, %v2967_v28  }
  0x3a   :  { %239 = vperm.xlu1 %2731, %v2974_v29   ;;  %234 = vperm.xlu0 %2730, %v2979_v30  }
  0x3e   :  { %249 = vperm.xlu1 %2731, %v2986_v31   ;;  %244 = vperm.xlu0 %2730, %v2991_v32  }
  0x42   :  { %259 = vperm.xlu1 %2731, %v2998_v33   ;;  %254 = vperm.xlu0 %2730, %v3003_v34  }
  0x46   :  { %269 = vperm.xlu1 %2731, %v3010_v35   ;;  %264 = vperm.xlu0 %2730, %v3015_v36  }
  0x4a   :  { %279 = vperm.xlu1 %2731, %v3022_v37   ;;  %274 = vperm.xlu0 %2730, %v3027_v38  }
  0x4e   :  { %289 = vperm.xlu1 %2731, %v3034_v39   ;;  %284 = vperm.xlu0 %2730, %v3039_v40  }
  0x52   :  { %299 = vperm.xlu1 %2731, %v3046_v41   ;;  %294 = vperm.xlu0 %2730, %v3051_v42  }
  0x56   :  { %309 = vperm.xlu1 %2731, %v3058_v43   ;;  %304 = vperm.xlu0 %2730, %v3063_v44  }
  0x5a   :  { %319 = vperm.xlu1 %2731, %v3070_v45   ;;  %314 = vperm.xlu0 %2730, %v3075_v46  }
  0x5e   :  { %329 = vperm.xlu1 %2731, %v3082_v47   ;;  %324 = vperm.xlu0 %2730, %v3087_v48  }
  0x62   :  { %339 = vperm.xlu1 %2731, %v3094_v49   ;;  %334 = vperm.xlu0 %2730, %v3099_v50  }
  0x66   :  { %349 = vperm.xlu1 %2731, %v3106_v51   ;;  %344 = vperm.xlu0 %2730, %v3111_v52  }
  0x6a   :  { %359 = vperm.xlu1 %2731, %v3118_v53   ;;  %354 = vperm.xlu0 %2730, %v3123_v54  }
  0x6e   :  { %369 = vperm.xlu1 %2731, %v3130_v55   ;;  %364 = vperm.xlu0 %2730, %v3135_v56  }
  0x72   :  { %379 = vperm.xlu1 %2731, %v3142_v57   ;;  %374 = vperm.xlu0 %2730, %v3147_v58  }
  0x76   :  { %389 = vperm.xlu1 %2731, %v3154_v59   ;;  %384 = vperm.xlu0 %2730, %v3159_v60  }
  0x7a   :  { %399 = vperm.xlu1 %2731, %v3166_v61   ;;  %394 = vperm.xlu0 %2730, %v3171_v62   ;;  %v4652_v61 = vmov 1  }
  0x7e   :  { %409 = vperm.xlu1 %2731, %v3178_v63   ;;  %404 = vperm.xlu0 %2730, %v3183_v0  }
  0x81   :  { %v3187_v57 = vpop.permute.xlu1 %104  ;;  %v3189_v60 = vpop.permute.xlu0 %94 }
  0x82   :  { %4674 = vst [vmem:[#allocation11_spill] sm:$0xff] %v3187_v57  ;;  %4675 = vst [vmem:[#allocation12_spill] sm:$0xff] %v3189_v60  ;;  %2733 = vset.pattern.permute.xlu1 %v4652_v61  ;;  %2732 = vset.pattern.permute.xlu0 %v4652_v61 }
  0x83   :  { %485 = vperm.xlu1 %2733, %v2823_v4   ;;  %481 = vperm.xlu0 %2732, %v2811_v2  }
  0x85   :  { %v3195_v53 = vpop.permute.xlu1 %109  ;;  %v3197_v56 = vpop.permute.xlu0 %99 }
  0x86   :  { %4676 = vst [vmem:[#allocation13_spill] sm:$0xff] %v3195_v53  ;;  %4677 = vst [vmem:[#allocation14_spill] sm:$0xff] %v3197_v56 }
  0x87   :  { %489 = vperm.xlu1 %2733, %v2806_v1   ;;  %493 = vperm.xlu0 %2732, %v2818_v3  }
  0x89   :  { %v3201_v57 = vpop.permute.xlu1 %119  ;;  %v3203_v60 = vpop.permute.xlu0 %114 }
  0x8a   :  { %4678 = vst [vmem:[#allocation15_spill] sm:$0xff] %v3201_v57  ;;  %4679 = vst [vmem:[#allocation16_spill] sm:$0xff] %v3203_v60 }
  0x8b   :  { %497 = vperm.xlu1 %2733, %v2835_v6   ;;  %501 = vperm.xlu0 %2732, %v2830_v5  }
  0x8d   :  { %v3207_v61 = vpop.permute.xlu1 %129  ;;  %v3209_v0 = vpop.permute.xlu0 %124 }
  0x8e   :  { %4680 = vst [vmem:[#allocation17_spill] sm:$0xff] %v3207_v61  ;;  %4681 = vst [vmem:[#allocation18_spill] sm:$0xff] %v3209_v0 }
  0x8f   :  { %505 = vperm.xlu1 %2733, %v2847_v8   ;;  %509 = vperm.xlu0 %2732, %v2842_v7  }
  0x91   :  { %v3213_v56 = vpop.permute.xlu1 %139  ;;  %v3215_v53 = vpop.permute.xlu0 %134 }
  0x92   :  { %4682 = vst [vmem:[#allocation19_spill] sm:$0xff] %v3213_v56  ;;  %4683 = vst [vmem:[#allocation20_spill] sm:$0xff] %v3215_v53 }
  0x93   :  { %513 = vperm.xlu1 %2733, %v2859_v10   ;;  %517 = vperm.xlu0 %2732, %v2854_v9  }
  0x95   :  { %v3219_v60 = vpop.permute.xlu1 %149  ;;  %v3221_v57 = vpop.permute.xlu0 %144 }
  0x96   :  { %4684 = vst [vmem:[#allocation21_spill] sm:$0xff] %v3219_v60  ;;  %4685 = vst [vmem:[#allocation22_spill] sm:$0xff] %v3221_v57 }
  0x97   :  { %521 = vperm.xlu1 %2733, %v2871_v12   ;;  %525 = vperm.xlu0 %2732, %v2866_v11  }
  0x99   :  { %v3225_v0 = vpop.permute.xlu1 %159  ;;  %v3227_v61 = vpop.permute.xlu0 %154 }
  0x9a   :  { %4686 = vst [vmem:[#allocation23_spill] sm:$0xff] %v3225_v0  ;;  %4687 = vst [vmem:[#allocation24_spill] sm:$0xff] %v3227_v61 }
  0x9b   :  { %529 = vperm.xlu1 %2733, %v2883_v14   ;;  %533 = vperm.xlu0 %2732, %v2878_v13  }
  0x9d   :  { %v3231_v53 = vpop.permute.xlu1 %169  ;;  %v3233_v56 = vpop.permute.xlu0 %164 }
  0x9e   :  { %4688 = vst [vmem:[#allocation25_spill] sm:$0xff] %v3231_v53  ;;  %4689 = vst [vmem:[#allocation26_spill] sm:$0xff] %v3233_v56 }
  0x9f   :  { %537 = vperm.xlu1 %2733, %v2895_v16   ;;  %541 = vperm.xlu0 %2732, %v2890_v15  }
  0xa1   :  { %v3237_v57 = vpop.permute.xlu1 %179  ;;  %v3239_v60 = vpop.permute.xlu0 %174 }
  0xa2   :  { %4690 = vst [vmem:[#allocation27_spill] sm:$0xff] %v3237_v57  ;;  %4691 = vst [vmem:[#allocation28_spill] sm:$0xff] %v3239_v60 }
  0xa3   :  { %545 = vperm.xlu1 %2733, %v2907_v18   ;;  %549 = vperm.xlu0 %2732, %v2902_v17  }
  0xa5   :  { %v3243_v61 = vpop.permute.xlu1 %189  ;;  %v3245_v0 = vpop.permute.xlu0 %184 }
  0xa6   :  { %4692 = vst [vmem:[#allocation29_spill] sm:$0xff] %v3243_v61  ;;  %4693 = vst [vmem:[#allocation30_spill] sm:$0xff] %v3245_v0 }
  0xa7   :  { %553 = vperm.xlu1 %2733, %v2919_v20   ;;  %557 = vperm.xlu0 %2732, %v2914_v19  }
  0xa9   :  { %v3249_v56 = vpop.permute.xlu1 %199  ;;  %v3251_v53 = vpop.permute.xlu0 %194 }
  0xaa   :  { %4694 = vst [vmem:[#allocation31_spill] sm:$0xff] %v3249_v56  ;;  %4695 = vst [vmem:[#allocation32_spill] sm:$0xff] %v3251_v53 }
  0xab   :  { %561 = vperm.xlu1 %2733, %v2931_v22   ;;  %565 = vperm.xlu0 %2732, %v2926_v21  }
  0xad   :  { %v3255_v60 = vpop.permute.xlu1 %209  ;;  %v3257_v57 = vpop.permute.xlu0 %204 }
  0xae   :  { %4696 = vst [vmem:[#allocation33_spill] sm:$0xff] %v3255_v60  ;;  %4697 = vst [vmem:[#allocation34_spill] sm:$0xff] %v3257_v57 }
  0xaf   :  { %569 = vperm.xlu1 %2733, %v2943_v24   ;;  %573 = vperm.xlu0 %2732, %v2938_v23  }
  0xb1   :  { %v3261_v61 = vpop.permute.xlu1 %219  ;;  %v3263_v0 = vpop.permute.xlu0 %214 }
  0xb2   :  { %4698 = vst [vmem:[#allocation35_spill] sm:$0xff] %v3261_v61  ;;  %4699 = vst [vmem:[#allocation36_spill] sm:$0xff] %v3263_v0 }
  0xb3   :  { %577 = vperm.xlu1 %2733, %v2955_v26   ;;  %581 = vperm.xlu0 %2732, %v2950_v25  }
  0xb5   :  { %v3267_v53 = vpop.permute.xlu1 %229  ;;  %v3269_v56 = vpop.permute.xlu0 %224 }
  0xb6   :  { %4700 = vst [vmem:[#allocation37_spill] sm:$0xff] %v3267_v53  ;;  %4701 = vst [vmem:[#allocation38_spill] sm:$0xff] %v3269_v56 }
  0xb7   :  { %585 = vperm.xlu1 %2733, %v2967_v28   ;;  %589 = vperm.xlu0 %2732, %v2962_v27  }
  0xb9   :  { %v3273_v60 = vpop.permute.xlu1 %239  ;;  %v3275_v57 = vpop.permute.xlu0 %234 }
  0xba   :  { %4702 = vst [vmem:[#allocation39_spill] sm:$0xff] %v3273_v60  ;;  %4703 = vst [vmem:[#allocation40_spill] sm:$0xff] %v3275_v57 }
  0xbb   :  { %593 = vperm.xlu1 %2733, %v2979_v30   ;;  %597 = vperm.xlu0 %2732, %v2974_v29  }
  0xbd   :  { %v3279_v0 = vpop.permute.xlu1 %249  ;;  %v3281_v61 = vpop.permute.xlu0 %244 }
  0xbe   :  { %4704 = vst [vmem:[#allocation41_spill] sm:$0xff] %v3279_v0  ;;  %4705 = vst [vmem:[#allocation42_spill] sm:$0xff] %v3281_v61 }
  0xbf   :  { %601 = vperm.xlu1 %2733, %v2991_v32   ;;  %605 = vperm.xlu0 %2732, %v2986_v31  }
  0xc1   :  { %v3285_v53 = vpop.permute.xlu1 %259  ;;  %v3287_v56 = vpop.permute.xlu0 %254 }
  0xc3   :  { %609 = vperm.xlu1 %2733, %v3003_v34   ;;  %613 = vperm.xlu0 %2732, %v2998_v33  }
  0xc5   :  { %v3291_v57 = vpop.permute.xlu1 %269  ;;  %v3293_v30 = vpop.permute.xlu0 %264 }
  0xc6   :  { %4706 = vst [vmem:[#allocation43_spill] sm:$0xff] %v3293_v30  ;;  %v4658_v30 = vmov 2  }
  0xc7   :  { %617 = vperm.xlu1 %2733, %v3015_v36   ;;  %621 = vperm.xlu0 %2732, %v3010_v35  }
  0xc9   :  { %v3297_v0 = vpop.permute.xlu1 %279  ;;  %v3299_v61 = vpop.permute.xlu0 %274 }
  0xca   :  { %4707 = vst [vmem:[#allocation44_spill] sm:$0xff] %v3299_v61 }
  0xcb   :  { %625 = vperm.xlu1 %2733, %v3027_v38   ;;  %629 = vperm.xlu0 %2732, %v3022_v37  }
  0xcd   :  { %v3303_v31 = vpop.permute.xlu1 %289  ;;  %v3305_v60 = vpop.permute.xlu0 %284 }
  0xce   :  { %4708 = vst [vmem:[#allocation45_spill] sm:$0xff] %v3303_v31  ;;  %4709 = vst [vmem:[#allocation46_spill] sm:$0xff] %v3305_v60 }
  0xcf   :  { %633 = vperm.xlu1 %2733, %v3039_v40   ;;  %641 = vperm.xlu0 %2732, %v3051_v42  }
  0xd1   :  { %v3309_v27 = vpop.permute.xlu1 %299  ;;  %v3311_v26 = vpop.permute.xlu0 %294 }
  0xd2   :  { %4710 = vst [vmem:[#allocation47_spill] sm:$0xff] %v3309_v27  ;;  %4711 = vst [vmem:[#allocation48_spill] sm:$0xff] %v3311_v26 }
  0xd3   :  { %2734 = vset.pattern.permute.xlu1 %v4658_v30  ;;  %653 = vperm.xlu0 %2732, %v3058_v43  }
  0xd4   :  { %873 = vperm.xlu1 %2734, %v2823_v4  }
  0xd5   :  { %v3316_v61 = vpop.permute.xlu1 %309  ;;  %v3318_v31 = vpop.permute.xlu0 %304 }
  0xd6   :  { %4712 = vst [vmem:[#allocation49_spill] sm:$0xff] %v3318_v31 }
  0xd7   :  { %657 = vperm.xlu0 %2732, %v3075_v46  }
  0xd8   :  { %997 = vperm.xlu1 %2734, %v3003_v34   ;;  %v4718_v34 = vmov 1  }
  0xd9   :  { %v3322_v60 = vpop.permute.xlu1 %319  ;;  %v3324_v27 = vpop.permute.xlu0 %314 }
  0xda   :  { %4713 = vst [vmem:[#allocation50_spill] sm:$0xff] %v3324_v27 }
  0xdb   :  { %669 = vperm.xlu0 %2732, %v3082_v47  }
  0xdc   :  { %877 = vperm.xlu1 %2734, %v2806_v1  }
  0xdd   :  { %v3328_v30 = vpop.permute.xlu1 %329  ;;  %v3330_v26 = vpop.permute.xlu0 %324 }
  0xde   :  { %4714 = vst [vmem:[#allocation51_spill] sm:$0xff] %v3328_v30  ;;  %4715 = vst [vmem:[#allocation52_spill] sm:$0xff] %v3330_v26  ;;  %v4722_v30 = vmov 2  }
  0xdf   :  { %673 = vperm.xlu0 %2732, %v3099_v50  }
  0xe0   :  { %1005 = vperm.xlu1 %2734, %v3015_v36  }
  0xe1   :  { %v3334_v4 = vpop.permute.xlu1 %339  ;;  %v3336_v31 = vpop.permute.xlu0 %334 }
  0xe2   :  { %4716 = vst [vmem:[#allocation53_spill] sm:$0xff] %v3334_v4  ;;  %4717 = vst [vmem:[#allocation54_spill] sm:$0xff] %v3336_v31 }
  0xe3   :  { %685 = vperm.xlu0 %2732, %v3106_v51  }
  0xe4   :  { %2735 = vset.pattern.permute.xlu1 %v4718_v34 }
  0xe5   :  { %v3340_v27 = vpop.permute.xlu1 %349  ;;  %637 = vperm.xlu1 %2735, %v3034_v39   ;;  %v3343_v1 = vpop.permute.xlu0 %344 }
  0xe6   :  { %4719 = vst [vmem:[#allocation55_spill] sm:$0xff] %v3340_v27  ;;  %4720 = vst [vmem:[#allocation56_spill] sm:$0xff] %v3343_v1 }
  0xe7   :  { %689 = vperm.xlu0 %2732, %v3123_v54  }
  0xe9   :  { %v3346_v26 = vpop.permute.xlu1 %359  ;;  %2736 = vset.pattern.permute.xlu1 %v4722_v30  ;;  %v3349_v36 = vpop.permute.xlu0 %354 }
  0xea   :  { %4721 = vst [vmem:[#allocation57_spill] sm:$0xff] %v3346_v26  ;;  %4723 = vst [vmem:[#allocation58_spill] sm:$0xff] %v3349_v36  ;;  %889 = vperm.xlu1 %2736, %v2830_v5  }
  0xeb   :  { %701 = vperm.xlu0 %2732, %v3130_v55  }
  0xed   :  { %v3353_v4 = vpop.permute.xlu1 %369  ;;  %v3355_v31 = vpop.permute.xlu0 %364 }
  0xee   :  { %4724 = vst [vmem:[#allocation59_spill] sm:$0xff] %v3353_v4  ;;  %4725 = vst [vmem:[#allocation60_spill] sm:$0xff] %v3355_v31  ;;  %1017 = vperm.xlu1 %2736, %v3022_v37  }
  0xef   :  { %705 = vperm.xlu0 %2732, %v3147_v58  }
  0xf1   :  { %v3359_v27 = vpop.permute.xlu1 %379  ;;  %v3361_v1 = vpop.permute.xlu0 %374 }
  0xf2   :  { %4726 = vst [vmem:[#allocation61_spill] sm:$0xff] %v3359_v27  ;;  %4727 = vst [vmem:[#allocation62_spill] sm:$0xff] %v3361_v1  ;;  %897 = vperm.xlu1 %2736, %v2842_v7   ;;  %v4758_v1 = vld [vmem:[#allocation7_spill] sm:$0xff] }
  0xf3   :  { %717 = vperm.xlu0 %2732, %v3154_v59  }
  0xf5   :  { %v3365_v26 = vpop.permute.xlu1 %389  ;;  %v3367_v5 = vpop.permute.xlu0 %384 }
  0xf6   :  { %4728 = vst [vmem:[#allocation63_spill] sm:$0xff] %v3365_v26  ;;  %4729 = vst [vmem:[#allocation64_spill] sm:$0xff] %v3367_v5  ;;  %1025 = vperm.xlu1 %2736, %v3034_v39  }
  0xf7   :  { %721 = vperm.xlu0 %2732, %v3171_v62  }
  0xf9   :  { %v3371_v4 = vpop.permute.xlu1 %399  ;;  %v3373_v37 = vpop.permute.xlu0 %394 }
  0xfa   :  { %4730 = vst [vmem:[#allocation65_spill] sm:$0xff] %v3371_v4  ;;  %4731 = vst [vmem:[#allocation66_spill] sm:$0xff] %v3373_v37  ;;  %2737 = vset.pattern.permute.xlu1 %v4718_v34  ;;  %v2750_v37 = vld [vmem:[%s4636_s4] sm:$0xff]  }
  0xfb   :  { %645 = vperm.xlu1 %2737, %v3046_v41   ;;  %733 = vperm.xlu0 %2732, %v3178_v63  }
  0xfc   :  { %2647 = vmatprep.subr.bf16.mxu0 %v2750_v37  ;;  %2719 = vmatprep.subr.bf16.mxu1 %v2750_v37 }
  0xfd   :  { %v3378_v7 = vpop.permute.xlu1 %409  ;;  %v3380_v27 = vpop.permute.xlu0 %404  ;;  %2648 = vmatpush3.bf16.msra.mxu0 %v2750_v37  ;;  %2723 = vmatpush3.bf16.msra.mxu1 %v2750_v37  ;;  %v2753_v37 = vld [vmem:[%s4636_s4 + $0x18] sm:$0xff]  }
  0xfe   :  { %4732 = vst [vmem:[#allocation67_spill] sm:$0xff] %v3378_v7  ;;  %4733 = vst [vmem:[#allocation68_spill] sm:$0xff] %v3380_v27  ;;  %v2752_v27 = vld [vmem:[%s4636_s4 + $0x10] sm:$0xff]  }
  0xff   :  { %649 = vperm.xlu1 %2737, %v3063_v44   ;;  %2748 = vset.pattern.permute.xlu0 %v4722_v30 }
 0x100   :  { %869 = vperm.xlu0 %2748, %v2811_v2   ;;  %v2751_v2 = vld [vmem:[%s4636_s4 + $0x8] sm:$0xff]  }
 0x101   :  { %2649 = vmatprep.subr.bf16.mxu0 %v2751_v2  ;;  %2720 = vmatprep.subr.bf16.mxu1 %v2751_v2 }
 0x102   :  { %v3385_v39 = vpop.permute.xlu1 %485  ;;  %v3387_v4 = vpop.permute.xlu0 %481  ;;  %2650 = vmatpush3.bf16.msra.mxu0 %v2751_v2  ;;  %2724 = vmatpush3.bf16.msra.mxu1 %v2751_v2 }
 0x103   :  { %2738 = vset.pattern.permute.xlu1 %v4722_v30  ;;  %2651 = vmatprep.subr.bf16.mxu0 %v2752_v27 }
 0x104   :  { %901 = vperm.xlu1 %2738, %v2859_v10   ;;  %1001 = vperm.xlu0 %2748, %v2998_v33  }
 0x105   :  { %2721 = vmatprep.subr.bf16.mxu1 %v2752_v27 }
 0x106   :  { %v3395_v63 = vpop.permute.xlu1 %489  ;;  %v3397_v7 = vpop.permute.xlu0 %493  ;;  %2652 = vmatpush3.bf16.msra.mxu0 %v2752_v27  ;;  %2725 = vmatpush3.bf16.msra.mxu1 %v2752_v27 }
 0x107   :  { %2653 = vmatprep.subr.bf16.mxu0 %v2753_v37  ;;  %2722 = vmatprep.subr.bf16.mxu1 %v2753_v37 }
 0x108   :  { %1029 = vperm.xlu1 %2738, %v3051_v42   ;;  %881 = vperm.xlu0 %2748, %v2818_v3  }
 0x10a   :  { %v3404_v10 = vpop.permute.xlu1 %497  ;;  %v3406_v33 = vpop.permute.xlu0 %501  ;;  %2654 = vmatpush3.bf16.msra.mxu0 %v2753_v37  ;;  %2726 = vmatpush3.bf16.msra.mxu1 %v2753_v37 }
 0x10c   :  { %1033 = vperm.xlu1 %2738, %v3046_v41   ;;  %1009 = vperm.xlu0 %2748, %v3010_v35  }
 0x10e   :  { %v3413_v42 = vpop.permute.xlu1 %505  ;;  %v3415_v3 = vpop.permute.xlu0 %509 }
 0x110   :  { %913 = vperm.xlu1 %2738, %v2866_v11   ;;  %885 = vperm.xlu0 %2748, %v2835_v6  }
 0x112   :  { %v3422_v41 = vpop.permute.xlu1 %513  ;;  %v3424_v35 = vpop.permute.xlu0 %517 }
 0x114   :  { %1041 = vperm.xlu1 %2738, %v3058_v43   ;;  %1013 = vperm.xlu0 %2748, %v3027_v38  }
 0x116   :  { %v3428_v27 = vpop.permute.xlu1 %521  ;;  %v3430_v2 = vpop.permute.xlu0 %525 }
 0x118   :  { %2739 = vset.pattern.permute.xlu1 %v4718_v34  ;;  %893 = vperm.xlu0 %2748, %v2847_v8  }
 0x119   :  { %661 = vperm.xlu1 %2739, %v3070_v45  }
 0x11a   :  { %v3435_v6 = vpop.permute.xlu1 %529  ;;  %v3437_v11 = vpop.permute.xlu0 %533 }
 0x11c   :  { %1021 = vperm.xlu0 %2748, %v3039_v40  }
 0x11d   :  { %665 = vperm.xlu1 %2739, %v3087_v48  }
 0x11e   :  { %v3441_v43 = vpop.permute.xlu1 %537  ;;  %v3443_v38 = vpop.permute.xlu0 %541 }
 0x11f   :  { %4734 = vst [vmem:[#allocation69_spill] sm:$0xff] %v3441_v43  ;;  %4735 = vst [vmem:[#allocation70_spill] sm:$0xff] %v3443_v38  ;;  %v4782_v43 = vld [vmem:[#allocation21_spill] sm:$0xff] }
 0x120   :  { %905 = vperm.xlu0 %2748, %v2854_v9  }
 0x121   :  { %2740 = vset.pattern.permute.xlu1 %v4722_v30 }
 0x122   :  { %917 = vperm.xlu1 %2740, %v2883_v14   ;;  %v3448_v8 = vpop.permute.xlu1 %545  ;;  %v3450_v37 = vpop.permute.xlu0 %549 }
 0x123   :  { %4736 = vst [vmem:[#allocation71_spill] sm:$0xff] %v3448_v8  ;;  %4737 = vst [vmem:[#allocation72_spill] sm:$0xff] %v3450_v37  ;;  %v4775_v37 = vld [vmem:[#allocation15_spill] sm:$0xff] }
 0x124   :  { %909 = vperm.xlu0 %2748, %v2871_v12  }
 0x126   :  { %1045 = vperm.xlu1 %2740, %v3075_v46   ;;  %v3454_v40 = vpop.permute.xlu1 %553  ;;  %v3456_v26 = vpop.permute.xlu0 %557 }
 0x127   :  { %4738 = vst [vmem:[#allocation73_spill] sm:$0xff] %v3454_v40  ;;  %4739 = vst [vmem:[#allocation74_spill] sm:$0xff] %v3456_v26  ;;  %v4771_v26 = vld [vmem:[#allocation11_spill] sm:$0xff] }
 0x128   :  { %1037 = vperm.xlu0 %2748, %v3063_v44  }
 0x12a   :  { %1049 = vperm.xlu1 %2740, %v3070_v45   ;;  %v3460_v9 = vpop.permute.xlu1 %561  ;;  %v3462_v5 = vpop.permute.xlu0 %565 }
 0x12b   :  { %4740 = vst [vmem:[#allocation75_spill] sm:$0xff] %v3460_v9  ;;  %4741 = vst [vmem:[#allocation76_spill] sm:$0xff] %v3462_v5 }
 0x12c   :  { %921 = vperm.xlu0 %2748, %v2878_v13  }
 0x12e   :  { %929 = vperm.xlu1 %2740, %v2890_v15   ;;  %v3466_v14 = vpop.permute.xlu1 %569  ;;  %v3468_v12 = vpop.permute.xlu0 %573 }
 0x12f   :  { %4742 = vst [vmem:[#allocation77_spill] sm:$0xff] %v3466_v14  ;;  %4743 = vst [vmem:[#allocation78_spill] sm:$0xff] %v3468_v12  ;;  %v4763_v12 = vld [vmem:[#allocation10_spill] sm:$0xff] }
 0x130   :  { %925 = vperm.xlu0 %2748, %v2895_v16  }
 0x132   :  { %1057 = vperm.xlu1 %2740, %v3082_v47   ;;  %v3472_v46 = vpop.permute.xlu1 %577  ;;  %v3474_v44 = vpop.permute.xlu0 %581 }
 0x133   :  { %4744 = vst [vmem:[#allocation79_spill] sm:$0xff] %v3472_v46  ;;  %4745 = vst [vmem:[#allocation80_spill] sm:$0xff] %v3474_v44 }
 0x134   :  { %1053 = vperm.xlu0 %2748, %v3087_v48  }
 0x136   :  { %2741 = vset.pattern.permute.xlu1 %v4718_v34  ;;  %v3478_v45 = vpop.permute.xlu1 %585  ;;  %v3480_v13 = vpop.permute.xlu0 %589 }
 0x137   :  { %4746 = vst [vmem:[#allocation81_spill] sm:$0xff] %v3478_v45  ;;  %4747 = vst [vmem:[#allocation82_spill] sm:$0xff] %v3480_v13  ;;  %677 = vperm.xlu1 %2741, %v3094_v49  }
 0x138   :  { %937 = vperm.xlu0 %2748, %v2902_v17  }
 0x13a   :  { %v3484_v15 = vpop.permute.xlu1 %593  ;;  %v3486_v16 = vpop.permute.xlu0 %597 }
 0x13b   :  { %4748 = vst [vmem:[#allocation83_spill] sm:$0xff] %v3484_v15  ;;  %4749 = vst [vmem:[#allocation84_spill] sm:$0xff] %v3486_v16  ;;  %681 = vperm.xlu1 %2741, %v3111_v52  }
 0x13c   :  { %941 = vperm.xlu0 %2748, %v2919_v20  }
 0x13e   :  { %v3490_v47 = vpop.permute.xlu1 %601  ;;  %v3492_v48 = vpop.permute.xlu0 %605 }
 0x13f   :  { %4750 = vst [vmem:[#allocation85_spill] sm:$0xff] %v3490_v47  ;;  %4751 = vst [vmem:[#allocation86_spill] sm:$0xff] %v3492_v48  ;;  %2742 = vset.pattern.permute.xlu1 %v4722_v30 }
 0x140   :  { %933 = vperm.xlu1 %2742, %v2907_v18   ;;  %1069 = vperm.xlu0 %2748, %v3111_v52   ;;  %v4752_v52 = vld [vmem:[#allocation5_spill] sm:$0xff] }
 0x142   :  { %v3497_v13 = vpop.permute.xlu1 %609  ;;  %v3499_v17 = vpop.permute.xlu0 %613 }
 0x144   :  { %1061 = vperm.xlu1 %2742, %v3099_v50   ;;  %953 = vperm.xlu0 %2748, %v2926_v21  }
 0x146   :  { %v3503_v15 = vpop.permute.xlu1 %617  ;;  %v3505_v20 = vpop.permute.xlu0 %621 }
 0x148   :  { %1065 = vperm.xlu1 %2742, %v3094_v49   ;;  %957 = vperm.xlu0 %2748, %v2943_v24   ;;  %v4756_v24 = vld [vmem:[#allocation4_spill] sm:$0xff] }
 0x14a   :  { %v3509_v48 = vpop.permute.xlu1 %625  ;;  %v3511_v18 = vpop.permute.xlu0 %629 }
 0x14c   :  { %945 = vperm.xlu1 %2742, %v2914_v19   ;;  %1085 = vperm.xlu0 %2748, %v4752_v52  }
 0x14e   :  { %v3515_v47 = vpop.permute.xlu1 %633  ;;  %v3517_v50 = vpop.permute.xlu0 %641 }
 0x14f   :  { %4753 = vst [vmem:[#allocation5_spill] sm:$0xff] %v3515_v47  ;;  %4754 = vst [vmem:[#allocation87_spill] sm:$0xff] %v3517_v50 }
 0x150   :  { %1073 = vperm.xlu1 %2742, %v3106_v51   ;;  %969 = vperm.xlu0 %2748, %v2950_v25  }
 0x152   :  { %v3521_v21 = vpop.permute.xlu0 %653 }
 0x153   :  { %4755 = vst [vmem:[#allocation88_spill] sm:$0xff] %v3521_v21  ;;  %v3523_v49 = vpop.permute.xlu1 %873  ;;  %v4781_v21 = vld [vmem:[#allocation20_spill] sm:$0xff] }
 0x154   :  { %2743 = vset.pattern.permute.xlu1 %v4718_v34  ;;  %973 = vperm.xlu0 %2748, %v2967_v28  }
 0x155   :  { %693 = vperm.xlu1 %2743, %v4756_v24  }
 0x156   :  { %v3528_v19 = vpop.permute.xlu0 %657 }
 0x157   :  { %4757 = vst [vmem:[#allocation4_spill] sm:$0xff] %v3528_v19  ;;  %v3530_v16 = vpop.permute.xlu1 %997  ;;  %v4777_v19 = vld [vmem:[#allocation17_spill] sm:$0xff] }
 0x158   :  { %1101 = vperm.xlu0 %2748, %v4758_v1  }
 0x159   :  { %697 = vperm.xlu1 %2743, %v4752_v52   ;;  %v412_v52 = vlaneseq }
 0x15a   :  { %v3534_v51 = vpop.permute.xlu0 %669 }
 0x15b   :  { %4759 = vst [vmem:[#allocation7_spill] sm:$0xff] %v3534_v51  ;;  %v3536_v25 = vpop.permute.xlu1 %877 }
 0x15c   :  { %985 = vperm.xlu0 %2748, %v2974_v29  }
 0x15d   :  { %2744 = vset.pattern.permute.xlu1 %v4722_v30 }
 0x15e   :  { %949 = vperm.xlu1 %2744, %v2931_v22   ;;  %v3541_v28 = vpop.permute.xlu0 %673  ;;  %v413_v22 = vshrl.u32 %v412_v52, 7 }
 0x15f   :  { %4760 = vst [vmem:[#allocation89_spill] sm:$0xff] %v3541_v28  ;;  %v3543_v45 = vpop.permute.xlu1 %1005  ;;  %v4773_v28 = vld [vmem:[#allocation13_spill] sm:$0xff] }
 0x160   :  { %989 = vperm.xlu0 %2748, %v2991_v32   ;;  %v414_v32 = vsub.s32 0, %v413_v22  ;;  %v1126_v52 = vsub.s32 2, %v413_v22 }
 0x162   :  { %1077 = vperm.xlu1 %2744, %v3123_v54   ;;  %v3547_v46 = vpop.permute.xlu0 %685  ;;  %v91_v54 = vld [vmem:[%s4637_s1] sm:$0x7] }
 0x163   :  { %4761 = vst [vmem:[#allocation90_spill] sm:$0xff] %v3547_v46  ;;  %v4770_v46 = vld [vmem:[#allocation6_spill] sm:$0xff]  ;;  %v3598_v38 = vrot.slane %v91_v54, %v1126_v52 }
 0x164   :  { %v3549_v44 = vpop.permute.xlu1 %637  ;;  %1117 = vperm.xlu0 %2748, %v4763_v12   ;;  %v4784_v52 = vld [vmem:[#allocation22_spill] sm:$0xff] }
 0x165   :  { %4762 = vst [vmem:[#allocation91_spill] sm:$0xff] %v3549_v44 }
 0x166   :  { %1081 = vperm.xlu1 %2744, %v4756_v24   ;;  %v3553_v29 = vpop.permute.xlu0 %689  ;;  %v738_v24 = vsub.s32 1, %v413_v22  ;;  %v4774_v22 = vld [vmem:[#allocation14_spill] sm:$0xff] }
 0x167   :  { %4764 = vst [vmem:[#allocation92_spill] sm:$0xff] %v3553_v29  ;;  %v3568_v29 = vrot.slane %v91_v54, %v414_v32 }
 0x169   :  { %v3555_v31 = vpop.permute.xlu1 %889  ;;  %4767 = vst [vmem:[#allocation95_spill] sm:$0xff] %v3568_v29  ;;  %v418_v40 = vmul.f32 %v3568_v29, %v4771_v26  ;;  %v419_v32 = vmul.f32 %v3568_v29, %v4773_v28  ;;  %v417_v8 = vmul.f32 %v3568_v29, %v4774_v22  ;;  %v3588_v51 = vmul.f32 %v3568_v29, %v4775_v37  ;;  %v4779_v28 = vld [vmem:[#allocation18_spill] sm:$0xff]  ;;  %v4780_v22 = vld [vmem:[#allocation19_spill] sm:$0xff] }
 0x16a   :  { %961 = vperm.xlu1 %2744, %v2938_v23   ;;  %v3558_v36 = vpop.permute.xlu0 %701  ;;  %v3596_v26 = vmul.f32 %v3568_v29, %v4777_v19  ;;  %v3604_v62 = vmul.f32 %v3568_v29, %v4779_v28  ;;  %v3608_v37 = vmul.f32 %v3568_v29, %v4780_v22  ;;  %v3616_v19 = vmul.f32 %v3568_v29, %v4782_v43  ;;  %v4785_v28 = vld [vmem:[#allocation23_spill] sm:$0xff]  ;;  %v4787_v22 = vld [vmem:[#allocation24_spill] sm:$0xff]  ;;  %v4789_v43 = vld [vmem:[#allocation25_spill] sm:$0xff] }
 0x16b   :  { %4765 = vst [vmem:[#allocation93_spill] sm:$0xff] %v3558_v36  ;;  %v3575_v36 = vrot.slane %v91_v54, %v738_v24  ;;  %v4776_v24 = vld [vmem:[#allocation16_spill] sm:$0xff]  ;;  %v3622_v12 = vmul.f32 %v3568_v29, %v4784_v52  ;;  %v3630_v50 = vmul.f32 %v3568_v29, %v4787_v22  ;;  %v448_v22 = vmul.f32 %v3568_v29, %v3287_v56  ;;  %v4795_v56 = vld [vmem:[#allocation45_spill] sm:$0xff] }
 0x16d   :  { %v3563_v14 = vpop.permute.xlu1 %1017  ;;  %4788 = vst [vmem:[#allocation13_spill] sm:$0xff] %v3630_v50 }
 0x16e   :  { %1089 = vperm.xlu1 %2744, %v3130_v55   ;;  %v3566_v9 = vpop.permute.xlu0 %705  ;;  %v4772_v55 = vld [vmem:[#allocation12_spill] sm:$0xff] }
 0x16f   :  { %4766 = vst [vmem:[#allocation94_spill] sm:$0xff] %v3566_v9  ;;  %v416_v9 = vmul.f32 %v3568_v29, %v4772_v55 }
 0x171   :  { %v3570_v5 = vpop.permute.xlu1 %897 }
 0x172   :  { %4768 = vst [vmem:[#allocation96_spill] sm:$0xff] %v3570_v5  ;;  %2745 = vset.pattern.permute.xlu1 %v4718_v34  ;;  %v3573_v23 = vpop.permute.xlu0 %717  ;;  %v4791_v34 = vld [vmem:[#allocation26_spill] sm:$0xff] }
 0x173   :  { %4769 = vst [vmem:[#allocation97_spill] sm:$0xff] %v3573_v23  ;;  %709 = vperm.xlu1 %2745, %v4770_v46   ;;  %v3592_v23 = vmul.f32 %v3568_v29, %v4776_v24  ;;  %v3612_v24 = vmul.f32 %v3568_v29, %v4781_v21  ;;  %v741_v21 = vmul.f32 %v3575_v36, %v3385_v39  ;;  %v4793_v39 = vld [vmem:[#allocation43_spill] sm:$0xff] }
 0x174   :  { %v3641_v52 = vmul.f32 %v3568_v29, %v4791_v34  ;;  %v1129_v34 = vmul.f32 %v3598_v38, %v3523_v49  ;;  %v4799_v49 = vld [vmem:[#allocation47_spill] sm:$0xff] }
 0x175   :  { %v3600_v55 = vpop.permute.xlu1 %1025  ;;  %v3681_v5 = vmul.f32 %v3568_v29, %v4799_v49  ;;  %v742_v49 = vmul.f32 %v3575_v36, %v3395_v63 }
 0x176   :  { %4778 = vst [vmem:[#allocation6_spill] sm:$0xff] %v3600_v55  ;;  %v3618_v54 = vpop.permute.xlu0 %721  ;;  %v3626_v55 = vmul.f32 %v3568_v29, %v4785_v28  ;;  %4792 = vst [vmem:[#allocation15_spill] sm:$0xff] %v3641_v52  ;;  %v449_v28 = vmul.f32 %v3568_v29, %v3285_v53  ;;  %v3667_v52 = vmul.f32 %v3568_v29, %v4795_v56 }
 0x177   :  { %4783 = vst [vmem:[#allocation11_spill] sm:$0xff] %v3618_v54  ;;  %713 = vperm.xlu1 %2745, %v4758_v1   ;;  %v3637_v54 = vmul.f32 %v3568_v29, %v4789_v43  ;;  %v3653_v1 = vmul.f32 %v3568_v29, %v4793_v39  ;;  %v3657_v43 = vmul.f32 %v3568_v29, %v3297_v0 }
 0x178   :  { %4786 = vst [vmem:[#allocation12_spill] sm:$0xff] %v3626_v55  ;;  %v3649_v55 = vmul.f32 %v3568_v29, %v3291_v57  ;;  %v4796_v57 = vld [vmem:[#allocation46_spill] sm:$0xff]  ;;  %v740_v39 = vmul.f32 %v3575_v36, %v3387_v4  ;;  %v805_v56 = vadd.f32 %v741_v21, %v417_v8  ;;  %v3692_v4 = vmul.f32 %v3568_v29, %v3316_v61 }
 0x179   :  { %4790 = vst [vmem:[#allocation14_spill] sm:$0xff] %v3637_v54  ;;  %v4794_v54 = vld [vmem:[#allocation44_spill] sm:$0xff]  ;;  %v3671_v50 = vmul.f32 %v3568_v29, %v4796_v57  ;;  %v772_v57 = vmul.f32 %v3575_v36, %v3497_v13  ;;  %v4804_v8 = vld [vmem:[#allocation2_spill] sm:$0xff]  ;;  %v3705_v13 = vmul.f32 %v3568_v29, %v3322_v60  ;;  %v744_v60 = vmul.f32 %v3575_v36, %v3404_v10 }
 0x17a   :  { %v3663_v53 = vmul.f32 %v3568_v29, %v4794_v54  ;;  %v3675_v0 = vpop.permute.xlu1 %645  ;;  %v3677_v44 = vpop.permute.xlu0 %733  ;;  %v4800_v54 = vld [vmem:[#allocation48_spill] sm:$0xff]  ;;  %4801 = vst [vmem:[#allocation18_spill] sm:$0xff] %v3692_v4  ;;  %v4805_v21 = vld [vmem:[#allocation50_spill] sm:$0xff]  ;;  %v1193_v4 = vadd.f32 %v1129_v34, %v805_v56 }
 0x17b   :  { %4797 = vst [vmem:[#allocation16_spill] sm:$0xff] %v3671_v50  ;;  %4798 = vst [vmem:[#allocation17_spill] sm:$0xff] %v3677_v44  ;;  %v3685_v47 = vmul.f32 %v3568_v29, %v4800_v54  ;;  %2746 = vset.pattern.permute.xlu1 %v4722_v30  ;;  %v4802_v50 = vld [vmem:[#allocation49_spill] sm:$0xff]  ;;  %v743_v54 = vmul.f32 %v3575_v36, %v3397_v7  ;;  %v3709_v61 = vmul.f32 %v3568_v29, %v4805_v21  ;;  %v4807_v30 = vld [vmem:[#allocation52_spill] sm:$0xff] }
 0x17c   :  { %v3696_v44 = vmul.f32 %v3568_v29, %v4802_v50  ;;  %965 = vperm.xlu1 %2746, %v4804_v8   ;;  %v1160_v50 = vmul.f32 %v3598_v38, %v3530_v16  ;;  %v3719_v7 = vmul.f32 %v3568_v29, %v4807_v30  ;;  %v804_v8 = vadd.f32 %v740_v39, %v416_v9  ;;  %v3726_v21 = vld [vmem:[%s4638_s2] ss:$0 sm:$0xff] }
 0x17d   :  { %v745_v16 = vmul.f32 %v3575_v36, %v3406_v33  ;;  %v836_v56 = vadd.f32 %v772_v57, %v448_v22  ;;  %v773_v30 = vmul.f32 %v3575_v36, %v3499_v17  ;;  %v806_v39 = vadd.f32 %v742_v49, %v418_v40 }
 0x17e   :  { %4803 = vst [vmem:[#allocation19_spill] sm:$0xff] %v3696_v44  ;;  %v4806_v44 = vld [vmem:[#allocation51_spill] sm:$0xff]  ;;  %4808 = vst [vmem:[#allocation20_spill] sm:$0xff] %v3719_v7  ;;  %v3728_v34 = vpop.permute.xlu1 %649  ;;  %v807_v10 = vadd.f32 %v743_v54, %v419_v32  ;;  %v747_v33 = vmul.f32 %v3575_v36, %v3415_v3  ;;  %v1264_v22 = vmul.f32 %v3726_v21, %v1193_v4 }
 0x17f   :  { %v3715_v63 = vmul.f32 %v3568_v29, %v4806_v44  ;;  %v746_v44 = vmul.f32 %v3575_v36, %v3413_v42  ;;  %v870_v9 = vpop.permute.xlu0 %869  ;;  %v1130_v29 = vmul.f32 %v3598_v38, %v3536_v25  ;;  %v748_v42 = vmul.f32 %v3575_v36, %v3422_v41 }
 0x180   :  { %v1128_v7 = vmul.f32 %v3598_v38, %v870_v9  ;;  %1093 = vperm.xlu1 %2746, %v3147_v58   ;;  %v1224_v57 = vadd.f32 %v1160_v50, %v836_v56  ;;  %v3746_v17 = vadd.f32 %v744_v60, %v3592_v23  ;;  %v749_v40 = vmul.f32 %v3575_v36, %v3424_v35  ;;  %v3755_v58 = vld [vmem:[%s4639_s3] ss:$0 sm:$0xff]  ;;  %v4809_v9 = vld [vmem:[#allocation3_spill] sm:$0xff] }
 0x181   :  { %v774_v25 = vmul.f32 %v3575_v36, %v3503_v15  ;;  %v809_v41 = vadd.f32 %v745_v16, %v3588_v51  ;;  %v3759_v32 = vadd.f32 %v746_v44, %v3604_v62  ;;  %v750_v23 = vmul.f32 %v3575_v36, %v3428_v27 }
 0x182   :  { %v1192_v3 = vadd.f32 %v1128_v7, %v804_v8  ;;  %v837_v4 = vadd.f32 %v773_v30, %v449_v28  ;;  %v1194_v15 = vadd.f32 %v1130_v29, %v806_v39  ;;  %v1162_v54 = vmul.f32 %v3598_v38, %v3543_v45 }
 0x183   :  { %v3763_v35 = vpop.permute.xlu1 %901  ;;  %v1002_v49 = vpop.permute.xlu0 %1001  ;;  %v3771_v62 = vadd.f32 %v747_v33, %v3596_v26  ;;  %v3774_v51 = vadd.f32 %v748_v42, %v3612_v24  ;;  %v1295_v27 = vmul.f32 %v3726_v21, %v1224_v57  ;;  %v1335_v28 = vadd.f32 %v3755_v58, %v1264_v22 }
 0x184   :  { %v1263_v50 = vmul.f32 %v3726_v21, %v1192_v3  ;;  %v1161_v7 = vmul.f32 %v3598_v38, %v1002_v49  ;;  %1097 = vperm.xlu1 %2746, %v4770_v46   ;;  %v3779_v29 = vadd.f32 %v749_v40, %v3608_v37  ;;  %v838_v45 = vadd.f32 %v774_v25, %v3653_v1 }
 0x185   :  { %v3784_v46 = vadd.f32 %v750_v23, %v3622_v12  ;;  %v751_v26 = vmul.f32 %v3575_v36, %v3430_v2  ;;  %v775_v24 = vmul.f32 %v3575_v36, %v3505_v20  ;;  %v777_v16 = vmul.f32 %v3575_v36, %v3511_v18 }
 0x186   :  { %v1225_v8 = vadd.f32 %v1161_v7, %v837_v4  ;;  %v1334_v60 = vadd.f32 %v3755_v58, %v1263_v50  ;;  %v1265_v1 = vmul.f32 %v3726_v21, %v1194_v15  ;;  %v1226_v56 = vadd.f32 %v1162_v54, %v838_v45  ;;  %v4811_v45 = vld [vmem:[#allocation96_spill] sm:$0xff] }
 0x187   :  { %v3792_v44 = vpop.permute.xlu1 %1029  ;;  %v882_v37 = vpop.permute.xlu0 %881  ;;  %v1133_v2 = vmul.f32 %v3598_v38, %v3555_v31  ;;  %v1399_v20 = vmax.f32 %v1335_v28, 0.0  ;;  %v1366_v33 = vadd.f32 %v3755_v58, %v1295_v27  ;;  %v776_v18 = vmul.f32 %v3575_v36, %v3509_v48  ;;  %v4810_v27 = vld [vmem:[#allocation5_spill] sm:$0xff] }
 0x188   :  { %v1296_v30 = vmul.f32 %v3726_v21, %v1225_v8  ;;  %v1131_v12 = vmul.f32 %v3598_v38, %v882_v37  ;;  %977 = vperm.xlu1 %2746, %v4809_v9   ;;  %v1398_v39 = vmax.f32 %v1334_v60, 0.0  ;;  %v1165_v42 = vmul.f32 %v3598_v38, %v3563_v14  ;;  %v4814_v9 = vld [vmem:[#allocation8_spill] sm:$0xff] }
 0x189   :  { %v3807_v40 = vadd.f32 %v751_v26, %v3616_v19  ;;  %v3811_v25 = vmul.f32 %v3575_v36, %v3435_v6  ;;  %v839_v31 = vadd.f32 %v775_v24, %v3649_v55  ;;  %v841_v48 = vadd.f32 %v777_v16, %v3657_v43 }
 0x18a   :  { %v1195_v22 = vadd.f32 %v1131_v12, %v807_v10  ;;  %v1367_v57 = vadd.f32 %v3755_v58, %v1296_v30  ;;  %v1470_v4 = vpack.c.bf16 %v1399_v20, %v1398_v39  ;;  %v1336_v49 = vadd.f32 %v3755_v58, %v1265_v1 }
 0x18b   :  { %v1034_v3 = vpop.permute.xlu1 %1033  ;;  %v1010_v23 = vpop.permute.xlu0 %1009  ;;  %v1297_v14 = vmul.f32 %v3726_v21, %v1226_v56  ;;  %v1197_v19 = vadd.f32 %v1133_v2, %v809_v41  ;;  %v1430_v6 = vmax.f32 %v1366_v33, 0.0  ;;  %v753_v54 = vmul.f32 %v3575_v36, %v3437_v11  ;;  %v4812_v11 = vld [vmem:[#allocation91_spill] sm:$0xff] }
 0x18c   :  { %v1266_v10 = vmul.f32 %v3726_v21, %v1195_v22  ;;  %1105 = vperm.xlu1 %2746, %v3154_v59   ;;  %v1163_v15 = vmul.f32 %v3598_v38, %v1010_v23  ;;  %2655 = vmatprep.mubr.msk.bf16.mxu0 %vm1526_vm0, %v1470_v4  ;;  %v1431_v55 = vmax.f32 %v1367_v57, 0.0  ;;  %v840_v43 = vadd.f32 %v776_v18, %v3663_v53  ;;  %v4815_v2 = vld [vmem:[#allocation87_spill] sm:$0xff]  ;;  %v4816_v22 = vld [vmem:[#allocation6_spill] sm:$0xff] }
 0x18d   :  { %v1229_v50 = vadd.f32 %v1165_v42, %v841_v48  ;;  %v778_v28 = vmul.f32 %v3575_v36, %v4810_v27  ;;  %v1135_v59 = vmul.f32 %v3598_v38, %v4811_v45  ;;  %v1400_v24 = vmax.f32 %v1336_v49, 0.0 }
 0x18e   :  { %v1337_v7 = vadd.f32 %v3755_v58, %v1266_v10  ;;  %v1227_v41 = vadd.f32 %v1163_v15, %v839_v31  ;;  %v1486_v26 = vpack.c.bf16 %v1431_v55, %v1430_v6  ;;  %v1368_v16 = vadd.f32 %v3755_v58, %v1297_v14  ;;  %v4817_v6 = vld [vmem:[#allocation10_spill] sm:$0xff] }
 0x18f   :  { %v3829_v8 = vpop.permute.xlu1 %913  ;;  %v886_v60 = vpop.permute.xlu0 %885  ;;  %v779_v53 = vmul.f32 %v3575_v36, %v4812_v11  ;;  %v4813_v1 = vmov 1   ;;  %v1268_v56 = vmul.f32 %v3726_v21, %v1197_v19  ;;  %v780_v39 = vmul.f32 %v3575_v36, %v4815_v2  ;;  %v2754_v2 = vld [vmem:[%s4635_s0 + $0xe0] sm:$0xff] }
 0x190   :  { %v1401_v37 = vmax.f32 %v1337_v7, 0.0  ;;  %2747 = vset.pattern.permute.xlu1 %v4813_v1  ;;  %v1298_v30 = vmul.f32 %v3726_v21, %v1227_v41  ;;  %v1132_v12 = vmul.f32 %v3598_v38, %v886_v60  ;;  %2687 = vmatprep.mubr.msk.bf16.mxu1 %vm1526_vm0, %v1486_v26  ;;  %v1300_v20 = vmul.f32 %v3726_v21, %v1229_v50  ;;  %v4820_v1 = vld [vmem:[#allocation12_spill] sm:$0xff] }
 0x191   :  { %725 = vperm.xlu1 %2747, %v4814_v9   ;;  %v781_v33 = vmul.f32 %v3575_v36, %v3675_v0  ;;  %v1199_v42 = vadd.f32 %v1135_v59, %v3771_v62  ;;  %v1167_v57 = vmul.f32 %v3598_v38, %v4816_v22  ;;  %v1432_v49 = vmax.f32 %v1368_v16, 0.0 }
 0x192   :  { %v1471_v18 = vpack.c.bf16 %v1401_v37, %v1400_v24  ;;  %v1369_v31 = vadd.f32 %v3755_v58, %v1298_v30  ;;  %v1196_v23 = vadd.f32 %v1132_v12, %v3746_v17  ;;  %v843_v14 = vadd.f32 %v779_v53, %v3667_v52 }
 0x193   :  { %v3850_v4 = vpop.permute.xlu1 %1041  ;;  %v1014_v48 = vpop.permute.xlu0 %1013  ;;  %v1169_v10 = vmul.f32 %v3598_v38, %v1034_v3  ;;  %v1339_v62 = vadd.f32 %v3755_v58, %v1268_v56  ;;  %v1168_v19 = vmul.f32 %v3598_v38, %v3792_v44  ;;  %v844_v55 = vadd.f32 %v780_v39, %v3685_v47  ;;  %v4818_v44 = vld [vmem:[#allocation13_spill] sm:$0xff]  ;;  %v4821_v56 = vld [vmem:[#allocation16_spill] sm:$0xff] }
 0x194   :  { %v1164_v0 = vmul.f32 %v3598_v38, %v1014_v48  ;;  %2656 = vmatmul.mubr.msk.bf16.vlgmr.msra.gmra.mrb[0].mxu0 %vm1526_vm0, %v1471_v18  ;;  %v1433_v15 = vmax.f32 %v1369_v31, 0.0  ;;  %v1267_v17 = vmul.f32 %v3726_v21, %v1196_v23  ;;  %v1371_v52 = vadd.f32 %v3755_v58, %v1300_v20 }
 0x195   :  { %729 = vperm.xlu1 %2747, %v4817_v6   ;;  %v845_v3 = vadd.f32 %v781_v33, %v3681_v5  ;;  %v1270_v7 = vmul.f32 %v3726_v21, %v1199_v42  ;;  %v1231_v27 = vadd.f32 %v1167_v57, %v843_v14  ;;  %v3868_v60 = vadd.f32 %v3811_v25, %v4818_v44  ;;  %v4822_v57 = vld [vmem:[#allocation69_spill] sm:$0xff]  ;;  %v4823_v14 = vld [vmem:[#allocation88_spill] sm:$0xff] }
 0x196   :  { %v1228_v50 = vadd.f32 %v1164_v0, %v840_v43  ;;  %v1338_v45 = vadd.f32 %v3755_v58, %v1267_v17  ;;  %v1487_v41 = vpack.c.bf16 %v1433_v15, %v1432_v49  ;;  %v1403_v5 = vmax.f32 %v1339_v62, 0.0  ;;  %v4825_v17 = vld [vmem:[#allocation70_spill] sm:$0xff] }
 0x197   :  { %v894_v59 = vpop.permute.xlu0 %893  ;;  %v1233_v26 = vadd.f32 %v1169_v10, %v845_v3  ;;  %v1136_v43 = vmul.f32 %v3598_v38, %v3763_v35  ;;  %v1232_v11 = vadd.f32 %v1168_v19, %v844_v55  ;;  %v4819_v37 = vmov 2   ;;  %v4824_v19 = vld [vmem:[#allocation9_spill] sm:$0xff] }
 0x198   :  { %v1299_v24 = vmul.f32 %v3726_v21, %v1228_v50  ;;  %v1134_v47 = vmul.f32 %v3598_v38, %v894_v59  ;;  %v3872_v16 = vpop.permute.xlu1 %661  ;;  %v1402_v53 = vmax.f32 %v1338_v45, 0.0  ;;  %2688 = vmatmul.mubr.msk.bf16.vlgmr.msra.gmra.mrb[0].mxu1 %vm1526_vm0, %v1487_v41  ;;  %v3879_v25 = vadd.f32 %v753_v54, %v4820_v1 }
 0x199   :  { %2749 = vset.pattern.permute.xlu1 %v4819_v37  ;;  %v842_v30 = vadd.f32 %v778_v28, %v4821_v56  ;;  %v1435_v35 = vmax.f32 %v1371_v52, 0.0  ;;  %v1341_v39 = vadd.f32 %v3755_v58, %v1270_v7  ;;  %v1302_v20 = vmul.f32 %v3726_v21, %v1231_v27 }
 0x19a   :  { %v1370_v12 = vadd.f32 %v3755_v58, %v1299_v24  ;;  %v1198_v9 = vadd.f32 %v1134_v47, %v3759_v32  ;;  %981 = vperm.xlu1 %2749, %v2754_v2   ;;  %v1472_v18 = vpack.c.bf16 %v1403_v5, %v1402_v53  ;;  %v1304_v54 = vmul.f32 %v3726_v21, %v1233_v26  ;;  %v4827_v47 = vld [vmem:[#allocation18_spill] sm:$0xff]  ;;  %v2755_v53 = vld [vmem:[%s4635_s0 + $0x1e8] sm:$0xff] }
 0x19b   :  { %v1022_v33 = vpop.permute.xlu0 %1021  ;;  %v754_v31 = vmul.f32 %v3575_v36, %v4822_v57  ;;  %v1200_v23 = vadd.f32 %v1136_v43, %v3774_v51  ;;  %v1303_v48 = vmul.f32 %v3726_v21, %v1232_v11  ;;  %v1139_v49 = vmul.f32 %v3598_v38, %v3829_v8  ;;  %v4826_v51 = vld [vmem:[#allocation4_spill] sm:$0xff] }
 0x19c   :  { %v1434_v42 = vmax.f32 %v1370_v12, 0.0  ;;  %v1269_v28 = vmul.f32 %v3726_v21, %v1198_v9  ;;  %v1166_v22 = vmul.f32 %v3598_v38, %v1022_v33  ;;  %v3892_v32 = vpop.permute.xlu1 %665  ;;  %2659 = vmatprep.mubr.msk.bf16.mxu0 %vm1526_vm0, %v1472_v18  ;;  %v783_v10 = vmul.f32 %v3575_v36, %v4823_v14 }
 0x19d   :  { %v3907_v6 = vmul.f32 %v3575_v36, %v4825_v17  ;;  %v784_v55 = vmul.f32 %v3575_v36, %v4826_v51  ;;  %v1405_v52 = vmax.f32 %v1341_v39, 0.0  ;;  %v1373_v8 = vadd.f32 %v3755_v58, %v1302_v20 }
 0x19e   :  { %v1340_v0 = vadd.f32 %v3755_v58, %v1269_v28  ;;  %v1230_v62 = vadd.f32 %v1166_v22, %v842_v30  ;;  %1109 = vperm.xlu1 %2749, %v4824_v19   ;;  %v1488_v15 = vpack.c.bf16 %v1435_v35, %v1434_v42  ;;  %v1375_v50 = vadd.f32 %v3755_v58, %v1304_v54  ;;  %v2756_v28 = vld [vmem:[%s4635_s0 + $0xf8] sm:$0xff]  ;;  %v4828_v22 = vld [vmem:[#allocation15_spill] sm:$0xff] }
 0x19f   :  { %v906_v3 = vpop.permute.xlu0 %905  ;;  %v1271_v59 = vmul.f32 %v3726_v21, %v1200_v23  ;;  %v1374_v41 = vadd.f32 %v3755_v58, %v1303_v48  ;;  %v1203_v44 = vadd.f32 %v1139_v49, %v3807_v40  ;;  %v1171_v26 = vmul.f32 %v3598_v38, %v3850_v4  ;;  %v4829_v23 = vld [vmem:[#allocation19_spill] sm:$0xff] }
 0x1a0   :  { %v1404_v7 = vmax.f32 %v1340_v0, 0.0  ;;  %v1301_v27 = vmul.f32 %v3726_v21, %v1230_v62  ;;  %v1137_v45 = vmul.f32 %v3598_v38, %v906_v3  ;;  %2691 = vmatprep.mubr.msk.bf16.mxu1 %vm1526_vm0, %v1488_v15  ;;  %v847_v5 = vadd.f32 %v783_v10, %v4827_v47 }
 0x1a1   :  { %v918_v24 = vpop.permute.xlu1 %917  ;;  %v848_v1 = vadd.f32 %v784_v55, %v3709_v61  ;;  %v1437_v56 = vmax.f32 %v1373_v8, 0.0  ;;  %v782_v40 = vmul.f32 %v3575_v36, %v3728_v34  ;;  %v1439_v12 = vmax.f32 %v1375_v50, 0.0  ;;  %v2757_v8 = vld [vmem:[%s4635_s0 + $0x1f8] sm:$0xff] }
 0x1a2   :  { %v1372_v43 = vadd.f32 %v3755_v58, %v1301_v27  ;;  %v1201_v11 = vadd.f32 %v1137_v45, %v3779_v29  ;;  %1113 = vperm.xlu1 %2749, %v2755_v53   ;;  %v1473_v37 = vpack.c.bf16 %v1405_v52, %v1404_v7  ;;  %v1140_v4 = vmul.f32 %v3598_v38, %v918_v24  ;;  %v4831_v53 = vld [vmem:[#allocation14_spill] sm:$0xff] }
 0x1a3   :  { %v910_v30 = vpop.permute.xlu0 %909  ;;  %v1342_v35 = vadd.f32 %v3755_v58, %v1271_v59  ;;  %v1438_v39 = vmax.f32 %v1374_v41, 0.0  ;;  %v1274_v61 = vmul.f32 %v3726_v21, %v1203_v44  ;;  %v1235_v20 = vadd.f32 %v1171_v26, %v847_v5  ;;  %v4830_v59 = vld [vmem:[#allocation7_spill] sm:$0xff] }
 0x1a4   :  { %v1436_v9 = vmax.f32 %v1372_v43, 0.0  ;;  %v1272_v2 = vmul.f32 %v3726_v21, %v1201_v11  ;;  %v1138_v29 = vmul.f32 %v3598_v38, %v910_v30  ;;  %2660 = vmatmul.mubr.msk.bf16.gmra.mrb[4].mxu0 %vm1526_vm0, %v1473_v37  ;;  %v785_v34 = vmul.f32 %v3575_v36, %v3872_v16 }
 0x1a5   :  { %v1046_v33 = vpop.permute.xlu1 %1045  ;;  %v818_v57 = vadd.f32 %v754_v31, %v4828_v22  ;;  %v846_v48 = vadd.f32 %v782_v40, %v4829_v23  ;;  %v1204_v49 = vadd.f32 %v1140_v4, %v3868_v60  ;;  %v1406_v19 = vmax.f32 %v1342_v35, 0.0 }
 0x1a6   :  { %v1343_v18 = vadd.f32 %v3755_v58, %v1272_v2  ;;  %v1202_v54 = vadd.f32 %v1138_v29, %v3784_v46  ;;  %v1172_v42 = vmul.f32 %v3598_v38, %v1046_v33  ;;  %993 = vperm.xlu1 %2749, %v2756_v28   ;;  %v1489_v10 = vpack.c.bf16 %v1437_v56, %v1436_v9 }
 0x1a7   :  { %v1038_v14 = vpop.permute.xlu0 %1037  ;;  %v1490_v46 = vpack.c.bf16 %v1439_v12, %v1438_v39  ;;  %v1345_v15 = vadd.f32 %v3755_v58, %v1274_v61  ;;  %v1306_v17 = vmul.f32 %v3726_v21, %v1235_v20  ;;  %v849_v55 = vadd.f32 %v785_v34, %v3705_v13  ;;  %v4832_v61 = vld [vmem:[#allocation20_spill] sm:$0xff] }
 0x1a8   :  { %v1407_v16 = vmax.f32 %v1343_v18, 0.0  ;;  %v1273_v0 = vmul.f32 %v3726_v21, %v1202_v54  ;;  %v1236_v62 = vadd.f32 %v1172_v42, %v848_v1  ;;  %v1170_v51 = vmul.f32 %v3598_v38, %v1038_v14  ;;  %2692 = vmatmul.mubr.msk.bf16.gmra.mrb[4].mxu1 %vm1526_vm0, %v1489_v10 }
 0x1a9   :  { %v1050_v31 = vpop.permute.xlu1 %1049  ;;  %2695 = vmatprep.mubr.msk.bf16.mxu1 %vm1526_vm0, %v1490_v46  ;;  %v1275_v3 = vmul.f32 %v3726_v21, %v1204_v49  ;;  %v787_v13 = vmul.f32 %v3575_v36, %v4830_v59  ;;  %v1409_v24 = vmax.f32 %v1345_v15, 0.0  ;;  %v1377_v47 = vadd.f32 %v3755_v58, %v1306_v17 }
 0x1aa   :  { %v1344_v60 = vadd.f32 %v3755_v58, %v1273_v0  ;;  %v1173_v52 = vmul.f32 %v3598_v38, %v1050_v31  ;;  %1121 = vperm.xlu1 %2749, %v2757_v8   ;;  %v1307_v50 = vmul.f32 %v3726_v21, %v1236_v62  ;;  %v1234_v7 = vadd.f32 %v1170_v51, %v846_v48 }
 0x1ab   :  { %v922_v27 = vpop.permute.xlu0 %921  ;;  %v1474_v45 = vpack.c.bf16 %v1407_v16, %v1406_v19  ;;  %v786_v5 = vmul.f32 %v3575_v36, %v3892_v32  ;;  %v819_v37 = vadd.f32 %v3907_v6, %v4831_v53  ;;  %v1346_v4 = vadd.f32 %v3755_v58, %v1275_v3  ;;  %v4833_v19 = vld [vmem:[#allocation72_spill] sm:$0xff] }
 0x1ac   :  { %v1408_v41 = vmax.f32 %v1344_v60, 0.0  ;;  %v1237_v44 = vadd.f32 %v1173_v52, %v849_v55  ;;  %v1141_v26 = vmul.f32 %v3598_v38, %v922_v27  ;;  %v1305_v43 = vmul.f32 %v3726_v21, %v1234_v7  ;;  %v4834_v55 = vld [vmem:[#allocation27_spill] sm:$0xff]  ;;  %v4837_v53 = vld [vmem:[#allocation28_spill] sm:$0xff] }
 0x1ad   :  { %2663 = vmatprep.mubr.msk.bf16.mxu0 %vm1526_vm0, %v1474_v45  ;;  %v930_v11 = vpop.permute.xlu1 %929  ;;  %v1378_v30 = vadd.f32 %v3755_v58, %v1307_v50  ;;  %v851_v39 = vadd.f32 %v787_v13, %v3715_v63  ;;  %v850_v20 = vadd.f32 %v786_v5, %v4832_v61  ;;  %v1410_v22 = vmax.f32 %v1346_v4, 0.0  ;;  %v4835_v60 = vld [vmem:[#allocation95_spill] sm:$0xff] }
 0x1ae   :  { %v1308_v1 = vmul.f32 %v3726_v21, %v1237_v44  ;;  %v1205_v56 = vadd.f32 %v1141_v26, %v3879_v25  ;;  %v1143_v40 = vmul.f32 %v3598_v38, %v930_v11  ;;  %v1376_v32 = vadd.f32 %v3755_v58, %v1305_v43 }
 0x1af   :  { %v926_v12 = vpop.permute.xlu0 %925  ;;  %v1475_v9 = vpack.c.bf16 %v1409_v24, %v1408_v41  ;;  %v1441_v25 = vmax.f32 %v1377_v47, 0.0  ;;  %v1442_v23 = vmax.f32 %v1378_v30, 0.0  ;;  %v433_v52 = vmul.f32 %v4835_v60, %v4834_v55  ;;  %v4836_v24 = vld [vmem:[#allocation71_spill] sm:$0xff]  ;;  %v4838_v30 = vld [vmem:[#allocation89_spill] sm:$0xff] }
 0x1b0   :  { %v1379_v2 = vadd.f32 %v3755_v58, %v1308_v1  ;;  %v1276_v29 = vmul.f32 %v3726_v21, %v1205_v56  ;;  %v1207_v35 = vadd.f32 %v1143_v40, %v819_v37  ;;  %v1142_v6 = vmul.f32 %v3598_v38, %v926_v12 }
 0x1b1   :  { %v1440_v33 = vmax.f32 %v1376_v32, 0.0  ;;  %2664 = vmatmul.mubr.msk.bf16.gmra.mrb[8].mxu0 %vm1526_vm0, %v1475_v9  ;;  %v1058_v34 = vpop.permute.xlu1 %1057  ;;  %v756_v47 = vmul.f32 %v3575_v36, %v4836_v24  ;;  %v432_v37 = vmul.f32 %v4835_v60, %v4837_v53  ;;  %v788_v32 = vmul.f32 %v3575_v36, %v4838_v30 }
 0x1b2   :  { %v1443_v18 = vmax.f32 %v1379_v2, 0.0  ;;  %v1347_v54 = vadd.f32 %v3755_v58, %v1276_v29  ;;  %v1278_v42 = vmul.f32 %v3726_v21, %v1207_v35  ;;  %v1206_v28 = vadd.f32 %v1142_v6, %v818_v57  ;;  %v4839_v2 = vld [vmem:[#allocation73_spill] sm:$0xff]  ;;  %v4840_v35 = vld [vmem:[#allocation54_spill] sm:$0xff] }
 0x1b3   :  { %v1175_v48 = vmul.f32 %v3598_v38, %v1058_v34  ;;  %v1054_v49 = vpop.permute.xlu0 %1053  ;;  %v1491_v14 = vpack.c.bf16 %v1441_v25, %v1440_v33  ;;  %v757_v57 = vmul.f32 %v3575_v36, %v4833_v19  ;;  %v820_v4 = vadd.f32 %v756_v47, %v432_v37  ;;  %v4841_v25 = vld [vmem:[#allocation30_spill] sm:$0xff] }
 0x1b4   :  { %v1411_v63 = vmax.f32 %v1347_v54, 0.0  ;;  %v1349_v10 = vadd.f32 %v3755_v58, %v1278_v42  ;;  %v1277_v16 = vmul.f32 %v3726_v21, %v1206_v28  ;;  %v1174_v0 = vmul.f32 %v3598_v38, %v1054_v49 }
 0x1b5   :  { %v1239_v62 = vadd.f32 %v1175_v48, %v851_v39  ;;  %2696 = vmatmul.mubr.msk.bf16.gmra.mrb[8].mxu1 %vm1526_vm0, %v1491_v14  ;;  %v1492_v46 = vpack.c.bf16 %v1443_v18, %v1442_v23  ;;  %v821_v13 = vadd.f32 %v757_v57, %v433_v52  ;;  %v758_v29 = vmul.f32 %v3575_v36, %v4839_v2  ;;  %v4842_v23 = vld [vmem:[#allocation53_spill] sm:$0xff] }
 0x1b6   :  { %v1348_v15 = vadd.f32 %v3755_v58, %v1277_v16  ;;  %v1238_v17 = vadd.f32 %v1174_v0, %v850_v20  ;;  %v678_v51 = vpop.permute.xlu1 %677  ;;  %v1476_v31 = vpack.c.bf16 %v1411_v63, %v1410_v22  ;;  %v1413_v50 = vmax.f32 %v1349_v10, 0.0  ;;  %v4843_v63 = vld [vmem:[#allocation56_spill] sm:$0xff] }
 0x1b7   :  { %v1310_v8 = vmul.f32 %v3726_v21, %v1239_v62  ;;  %2699 = vmatprep.mubr.msk.bf16.mxu1 %vm1526_vm0, %v1492_v46  ;;  %v938_v3 = vpop.permute.xlu0 %937  ;;  %v464_v6 = vmul.f32 %v4835_v60, %v4840_v35  ;;  %v434_v61 = vmul.f32 %v4835_v60, %v4841_v25  ;;  %v789_v20 = vmul.f32 %v3575_v36, %v678_v51  ;;  %v4844_v62 = vld [vmem:[#allocation74_spill] sm:$0xff] }
 0x1b8   :  { %v1412_v7 = vmax.f32 %v1348_v15, 0.0  ;;  %v1309_v27 = vmul.f32 %v3726_v21, %v1238_v17  ;;  %v1145_v45 = vmul.f32 %v3598_v38, %v938_v3  ;;  %2667 = vmatprep.mubr.msk.bf16.mxu0 %vm1526_vm0, %v1476_v31  ;;  %v465_v48 = vmul.f32 %v4835_v60, %v4842_v23  ;;  %v4845_v3 = vld [vmem:[#allocation29_spill] sm:$0xff] }
 0x1b9   :  { %v1381_v59 = vadd.f32 %v3755_v58, %v1310_v8  ;;  %v852_v18 = vadd.f32 %v788_v32, %v464_v6  ;;  %v822_v49 = vadd.f32 %v758_v29, %v434_v61  ;;  %v466_v10 = vmul.f32 %v4835_v60, %v4843_v63 }
 0x1ba   :  { %v1380_v41 = vadd.f32 %v3755_v58, %v1309_v27  ;;  %v682_v44 = vpop.permute.xlu1 %681  ;;  %v1477_v26 = vpack.c.bf16 %v1413_v50, %v1412_v7  ;;  %v1209_v11 = vadd.f32 %v1145_v45, %v821_v13  ;;  %v759_v46 = vmul.f32 %v3575_v36, %v4844_v62  ;;  %v4846_v45 = vld [vmem:[#allocation90_spill] sm:$0xff] }
 0x1bb   :  { %v1445_v5 = vmax.f32 %v1381_v59, 0.0  ;;  %v942_v1 = vpop.permute.xlu0 %941  ;;  %v790_v14 = vmul.f32 %v3575_v36, %v682_v44  ;;  %v853_v19 = vadd.f32 %v789_v20, %v465_v48  ;;  %v435_v50 = vmul.f32 %v4835_v60, %v4845_v3 }
 0x1bc   :  { %v1444_v43 = vmax.f32 %v1380_v41, 0.0  ;;  %2668 = vmatmul.mubr.msk.bf16.gmra.mrb[12].mxu0 %vm1526_vm0, %v1477_v26  ;;  %v1280_v12 = vmul.f32 %v3726_v21, %v1209_v11  ;;  %v1146_v33 = vmul.f32 %v3598_v38, %v942_v1  ;;  %v791_v59 = vmul.f32 %v3575_v36, %v4846_v45  ;;  %v4855_v45 = vld [vmem:[#allocation34_spill] sm:$0xff] }
 0x1bd   :  { %v854_v8 = vadd.f32 %v790_v14, %v466_v10  ;;  %v823_v26 = vadd.f32 %v759_v46, %v435_v50  ;;  %v4851_v46 = vld [vmem:[#allocation32_spill] sm:$0xff]  ;;  %v4854_v50 = vld [vmem:[#allocation58_spill] sm:$0xff] }
 0x1be   :  { %v1493_v56 = vpack.c.bf16 %v1445_v5, %v1444_v43  ;;  %v1351_v54 = vadd.f32 %v3755_v58, %v1280_v12  ;;  %v1210_v57 = vadd.f32 %v1146_v33, %v822_v49  ;;  %v4847_v43 = vld [vmem:[#allocation55_spill] sm:$0xff] }
 0x1bf   :  { %v934_v40 = vpop.permute.xlu1 %933  ;;  %v1070_v28 = vpop.permute.xlu0 %1069  ;;  %v467_v11 = vmul.f32 %v4835_v60, %v4847_v43 }
 0x1c0   :  { %v1144_v9 = vmul.f32 %v3598_v38, %v934_v40  ;;  %2700 = vmatmul.mubr.msk.bf16.gmra.mrb[12].mxu1 %vm1526_vm0, %v1493_v56  ;;  %v1178_v15 = vmul.f32 %v3598_v38, %v1070_v28  ;;  %v1415_v51 = vmax.f32 %v1351_v54, 0.0  ;;  %v1281_v13 = vmul.f32 %v3726_v21, %v1210_v57  ;;  %v4849_v54 = vld [vmem:[#allocation31_spill] sm:$0xff] }
 0x1c1   :  { %v855_v1 = vadd.f32 %v791_v59, %v467_v11  ;;  %v438_v59 = vmul.f32 %v4835_v60, %v4855_v45  ;;  %v4856_v11 = vld [vmem:[#allocation60_spill] sm:$0xff] }
 0x1c2   :  { %v1208_v39 = vadd.f32 %v1144_v9, %v820_v4  ;;  %v1242_v41 = vadd.f32 %v1178_v15, %v854_v8  ;;  %v1352_v56 = vadd.f32 %v3755_v58, %v1281_v13  ;;  %v4853_v8 = vld [vmem:[#allocation77_spill] sm:$0xff] }
 0x1c3   :  { %v1062_v34 = vpop.permute.xlu1 %1061  ;;  %v954_v2 = vpop.permute.xlu0 %953  ;;  %v762_v3 = vmul.f32 %v3575_v36, %v4853_v8 }
 0x1c4   :  { %v1279_v42 = vmul.f32 %v3726_v21, %v1208_v39  ;;  %v1176_v22 = vmul.f32 %v3598_v38, %v1062_v34  ;;  %v1313_v40 = vmul.f32 %v3726_v21, %v1242_v41  ;;  %v4848_v39 = vld [vmem:[#allocation76_spill] sm:$0xff]  ;;  %v1416_v61 = vmax.f32 %v1352_v56, 0.0 }
 0x1c5   :  { %v761_v25 = vmul.f32 %v3575_v36, %v4848_v39  ;;  %v1149_v28 = vmul.f32 %v3598_v38, %v954_v2 }
 0x1c6   :  { %v1350_v16 = vadd.f32 %v3755_v58, %v1279_v42  ;;  %v1240_v0 = vadd.f32 %v1176_v22, %v852_v18  ;;  %v1384_v20 = vadd.f32 %v3755_v58, %v1313_v40  ;;  %v437_v42 = vmul.f32 %v4835_v60, %v4849_v54 }
 0x1c7   :  { %v1066_v17 = vpop.permute.xlu1 %1065 }
 0x1c8   :  { %v1414_v31 = vmax.f32 %v1350_v16, 0.0  ;;  %v1311_v55 = vmul.f32 %v3726_v21, %v1240_v0  ;;  %v1177_v52 = vmul.f32 %v3598_v38, %v1066_v17  ;;  %v825_v48 = vadd.f32 %v761_v25, %v437_v42  ;;  %v4850_v16 = vld [vmem:[#allocation75_spill] sm:$0xff]  ;;  %v4860_v42 = vld [vmem:[#allocation93_spill] sm:$0xff] }
 0x1c9   :  { %v1448_v49 = vmax.f32 %v1384_v20, 0.0  ;;  %v760_v0 = vmul.f32 %v3575_v36, %v4850_v16  ;;  %v4861_v16 = vld [vmem:[#allocation59_spill] sm:$0xff] }
 0x1ca   :  { %v1241_v7 = vadd.f32 %v1177_v52, %v853_v19  ;;  %v1478_v27 = vpack.c.bf16 %v1415_v51, %v1414_v31  ;;  %v1382_v24 = vadd.f32 %v3755_v58, %v1311_v55  ;;  %v1213_v10 = vadd.f32 %v1149_v28, %v825_v48  ;;  %v4852_v51 = vld [vmem:[#allocation92_spill] sm:$0xff]  ;;  %v958_v55 = vpop.permute.xlu0 %957 }
 0x1cb   :  { %v946_v44 = vpop.permute.xlu1 %945  ;;  %v436_v19 = vmul.f32 %v4835_v60, %v4851_v46  ;;  %v792_v31 = vmul.f32 %v3575_v36, %v4852_v51  ;;  %v1150_v41 = vmul.f32 %v3598_v38, %v958_v55  ;;  %v795_v28 = vmul.f32 %v3575_v36, %v4860_v42  ;;  %v4869_v42 = vld [vmem:[#allocation38_spill] sm:$0xff] }
 0x1cc   :  { %v1312_v47 = vmul.f32 %v3726_v21, %v1241_v7  ;;  %v1147_v5 = vmul.f32 %v3598_v38, %v946_v44  ;;  %2671 = vmatprep.mubr.msk.bf16.mxu0 %vm1526_vm0, %v1478_v27  ;;  %v1446_v30 = vmax.f32 %v1382_v24, 0.0  ;;  %v1284_v57 = vmul.f32 %v3726_v21, %v1213_v10 }
 0x1cd   :  { %v824_v17 = vadd.f32 %v760_v0, %v436_v19  ;;  %v468_v7 = vmul.f32 %v4835_v60, %v4854_v50  ;;  %v471_v0 = vmul.f32 %v4835_v60, %v4861_v16 }
 0x1ce   :  { %v1383_v53 = vadd.f32 %v3755_v58, %v1312_v47  ;;  %v1211_v37 = vadd.f32 %v1147_v5, %v823_v26  ;;  %v1355_v13 = vadd.f32 %v3755_v58, %v1284_v57  ;;  %v1086_v40 = vpop.permute.xlu0 %1085 }
 0x1cf   :  { %v1074_v4 = vpop.permute.xlu1 %1073  ;;  %v856_v24 = vadd.f32 %v792_v31, %v468_v7  ;;  %v1182_v20 = vmul.f32 %v3598_v38, %v1086_v40  ;;  %v859_v19 = vadd.f32 %v795_v28, %v471_v0  ;;  %v442_v28 = vmul.f32 %v4835_v60, %v4869_v42  ;;  %v4870_v0 = vld [vmem:[#allocation64_spill] sm:$0xff] }
 0x1d0   :  { %v1447_v32 = vmax.f32 %v1383_v53, 0.0  ;;  %v1282_v12 = vmul.f32 %v3726_v21, %v1211_v37  ;;  %v1179_v9 = vmul.f32 %v3598_v38, %v1074_v4  ;;  %v470_v53 = vmul.f32 %v4835_v60, %v4856_v11 }
 0x1d1   :  { %v826_v37 = vadd.f32 %v762_v3, %v438_v59 }
 0x1d2   :  { %v1353_v29 = vadd.f32 %v3755_v58, %v1282_v12  ;;  %v1243_v35 = vadd.f32 %v1179_v9, %v855_v1  ;;  %v1494_v6 = vpack.c.bf16 %v1447_v32, %v1446_v30  ;;  %v4857_v1 = vld [vmem:[#allocation57_spill] sm:$0xff]  ;;  %v4858_v32 = vld [vmem:[#allocation78_spill] sm:$0xff]  ;;  %v1419_v9 = vmax.f32 %v1355_v13, 0.0  ;;  %v970_v8 = vpop.permute.xlu0 %969 }
 0x1d3   :  { %v469_v56 = vmul.f32 %v4835_v60, %v4857_v1  ;;  %v763_v12 = vmul.f32 %v3575_v36, %v4858_v32  ;;  %v1214_v2 = vadd.f32 %v1150_v41, %v826_v37 }
 0x1d4   :  { %v1417_v33 = vmax.f32 %v1353_v29, 0.0  ;;  %v1314_v34 = vmul.f32 %v3726_v21, %v1243_v35  ;;  %v694_v18 = vpop.permute.xlu1 %693  ;;  %2703 = vmatprep.mubr.msk.bf16.mxu1 %vm1526_vm0, %v1494_v6 }
 0x1d5   :  { %v793_v47 = vmul.f32 %v3575_v36, %v694_v18 }
 0x1d6   :  { %v1385_v22 = vadd.f32 %v3755_v58, %v1314_v34  ;;  %v1479_v23 = vpack.c.bf16 %v1417_v33, %v1416_v61  ;;  %v4859_v33 = vld [vmem:[#allocation33_spill] sm:$0xff] }
 0x1d7   :  { %v857_v6 = vadd.f32 %v793_v47, %v469_v56  ;;  %v439_v34 = vmul.f32 %v4835_v60, %v4859_v33 }
 0x1d8   :  { %v1449_v14 = vmax.f32 %v1385_v22, 0.0  ;;  %v698_v63 = vpop.permute.xlu1 %697  ;;  %2672 = vmatmul.mubr.msk.bf16.gmra.mrb[16].mxu0 %vm1526_vm0, %v1479_v23  ;;  %v1285_v22 = vmul.f32 %v3726_v21, %v1214_v2 }
 0x1d9   :  { %v794_v44 = vmul.f32 %v3575_v36, %v698_v63 }
 0x1da   :  { %v1495_v62 = vpack.c.bf16 %v1449_v14, %v1448_v49  ;;  %v827_v49 = vadd.f32 %v763_v12, %v439_v34  ;;  %v1356_v57 = vadd.f32 %v3755_v58, %v1285_v22  ;;  %v4865_v12 = vld [vmem:[#allocation36_spill] sm:$0xff]  ;;  %v4868_v34 = vld [vmem:[#allocation62_spill] sm:$0xff] }
 0x1db   :  { %v858_v29 = vadd.f32 %v794_v44, %v470_v53 }
 0x1dc   :  { %2704 = vmatmul.mubr.msk.bf16.gmra.mrb[16].mxu1 %vm1526_vm0, %v1495_v62  ;;  %v1420_v59 = vmax.f32 %v1356_v57, 0.0 }
 0x1dd   :  { %v950_v15 = vpop.permute.xlu1 %949  ;;  %v1246_v23 = vadd.f32 %v1182_v20, %v858_v29  ;;  %v4867_v20 = vld [vmem:[#allocation81_spill] sm:$0xff] }
 0x1de   :  { %v1148_v52 = vmul.f32 %v3598_v38, %v950_v15  ;;  %v766_v33 = vmul.f32 %v3575_v36, %v4867_v20 }
 0x1df   :  { %v1317_v15 = vmul.f32 %v3726_v21, %v1246_v23 }
 0x1e0   :  { %v1212_v27 = vadd.f32 %v1148_v52, %v824_v17 }
 0x1e1   :  { %v1078_v26 = vpop.permute.xlu1 %1077  ;;  %v1388_v13 = vadd.f32 %v3755_v58, %v1317_v15 }
 0x1e2   :  { %v1283_v5 = vmul.f32 %v3726_v21, %v1212_v27  ;;  %v1180_v43 = vmul.f32 %v3598_v38, %v1078_v26  ;;  %v4862_v27 = vld [vmem:[#allocation80_spill] sm:$0xff] }
 0x1e3   :  { %v765_v45 = vmul.f32 %v3575_v36, %v4862_v27  ;;  %v1452_v37 = vmax.f32 %v1388_v13, 0.0 }
 0x1e4   :  { %v1354_v4 = vadd.f32 %v3755_v58, %v1283_v5  ;;  %v1244_v30 = vadd.f32 %v1180_v43, %v856_v24  ;;  %v4863_v24 = vld [vmem:[#allocation35_spill] sm:$0xff]  ;;  %v1153_v5 = vmul.f32 %v3598_v38, %v970_v8 }
 0x1e5   :  { %v1082_v35 = vpop.permute.xlu1 %1081  ;;  %v441_v47 = vmul.f32 %v4835_v60, %v4863_v24 }
 0x1e6   :  { %v1418_v39 = vmax.f32 %v1354_v4, 0.0  ;;  %v1315_v25 = vmul.f32 %v3726_v21, %v1244_v30  ;;  %v1181_v61 = vmul.f32 %v3598_v38, %v1082_v35  ;;  %v4864_v4 = vld [vmem:[#allocation79_spill] sm:$0xff] }
 0x1e7   :  { %v829_v53 = vadd.f32 %v765_v45, %v441_v47  ;;  %v764_v30 = vmul.f32 %v3575_v36, %v4864_v4  ;;  %v4874_v47 = vld [vmem:[#allocation97_spill] sm:$0xff]  ;;  %v4875_v4 = vld [vmem:[#allocation63_spill] sm:$0xff] }
 0x1e8   :  { %v1245_v18 = vadd.f32 %v1181_v61, %v857_v6  ;;  %v1480_v54 = vpack.c.bf16 %v1419_v9, %v1418_v39  ;;  %v1386_v14 = vadd.f32 %v3755_v58, %v1315_v25  ;;  %v440_v9 = vmul.f32 %v4835_v60, %v4865_v12  ;;  %v4866_v6 = vld [vmem:[#allocation94_spill] sm:$0xff]  ;;  %v974_v25 = vpop.permute.xlu0 %973 }
 0x1e9   :  { %v962_v48 = vpop.permute.xlu1 %961  ;;  %v1217_v40 = vadd.f32 %v1153_v5, %v829_v53  ;;  %v796_v39 = vmul.f32 %v3575_v36, %v4866_v6  ;;  %v1154_v23 = vmul.f32 %v3598_v38, %v974_v25  ;;  %v799_v5 = vmul.f32 %v3575_v36, %v4874_v47  ;;  %v4883_v47 = vld [vmem:[#allocation42_spill] sm:$0xff] }
 0x1ea   :  { %v1316_v63 = vmul.f32 %v3726_v21, %v1245_v18  ;;  %v1151_v10 = vmul.f32 %v3598_v38, %v962_v48  ;;  %2675 = vmatprep.mubr.msk.bf16.mxu0 %vm1526_vm0, %v1480_v54  ;;  %v1450_v51 = vmax.f32 %v1386_v14, 0.0  ;;  %v828_v35 = vadd.f32 %v764_v30, %v440_v9 }
 0x1eb   :  { %v1288_v2 = vmul.f32 %v3726_v21, %v1217_v40  ;;  %v472_v18 = vmul.f32 %v4835_v60, %v4868_v34  ;;  %v475_v30 = vmul.f32 %v4835_v60, %v4875_v4 }
 0x1ec   :  { %v1387_v62 = vadd.f32 %v3755_v58, %v1316_v63  ;;  %v1215_v46 = vadd.f32 %v1151_v10, %v827_v49  ;;  %v1102_v15 = vpop.permute.xlu0 %1101 }
 0x1ed   :  { %v1090_v17 = vpop.permute.xlu1 %1089  ;;  %v1359_v22 = vadd.f32 %v3755_v58, %v1288_v2  ;;  %v860_v14 = vadd.f32 %v796_v39, %v472_v18  ;;  %v1186_v13 = vmul.f32 %v3598_v38, %v1102_v15  ;;  %v863_v9 = vadd.f32 %v799_v5, %v475_v30  ;;  %v4884_v30 = vld [vmem:[#allocation68_spill] sm:$0xff] }
 0x1ee   :  { %v1451_v31 = vmax.f32 %v1387_v62, 0.0  ;;  %v1286_v55 = vmul.f32 %v3726_v21, %v1215_v46  ;;  %v1183_v52 = vmul.f32 %v3598_v38, %v1090_v17  ;;  %v474_v62 = vmul.f32 %v4835_v60, %v4870_v0 }
 0x1ef   :  { %v830_v46 = vadd.f32 %v766_v33, %v442_v28  ;;  %v446_v5 = vmul.f32 %v4835_v60, %v4883_v47 }
 0x1f0   :  { %v1357_v3 = vadd.f32 %v3755_v58, %v1286_v55  ;;  %v1247_v50 = vadd.f32 %v1183_v52, %v859_v19  ;;  %v1496_v7 = vpack.c.bf16 %v1451_v31, %v1450_v51  ;;  %v4871_v19 = vld [vmem:[#allocation61_spill] sm:$0xff]  ;;  %v4872_v31 = vld [vmem:[#allocation82_spill] sm:$0xff]  ;;  %v1423_v52 = vmax.f32 %v1359_v22, 0.0  ;;  %v986_v20 = vpop.permute.xlu0 %985 }
 0x1f1   :  { %v473_v57 = vmul.f32 %v4835_v60, %v4871_v19  ;;  %v767_v55 = vmul.f32 %v3575_v36, %v4872_v31  ;;  %v1218_v8 = vadd.f32 %v1154_v23, %v830_v46 }
 0x1f2   :  { %v1421_v41 = vmax.f32 %v1357_v3, 0.0  ;;  %v1318_v44 = vmul.f32 %v3726_v21, %v1247_v50  ;;  %v710_v26 = vpop.permute.xlu1 %709  ;;  %2707 = vmatprep.mubr.msk.bf16.mxu1 %vm1526_vm0, %v1496_v7 }
 0x1f3   :  { %v797_v63 = vmul.f32 %v3575_v36, %v710_v26 }
 0x1f4   :  { %v1389_v43 = vadd.f32 %v3755_v58, %v1318_v44  ;;  %v1481_v11 = vpack.c.bf16 %v1421_v41, %v1420_v59  ;;  %v4873_v41 = vld [vmem:[#allocation37_spill] sm:$0xff] }
 0x1f5   :  { %v861_v7 = vadd.f32 %v797_v63, %v473_v57  ;;  %v443_v44 = vmul.f32 %v4835_v60, %v4873_v41 }
 0x1f6   :  { %v1453_v1 = vmax.f32 %v1389_v43, 0.0  ;;  %v714_v56 = vpop.permute.xlu1 %713  ;;  %2676 = vmatmul.mubr.msk.bf16.gmra.mrb[20].mxu0 %vm1526_vm0, %v1481_v11  ;;  %v1289_v43 = vmul.f32 %v3726_v21, %v1218_v8 }
 0x1f7   :  { %v798_v48 = vmul.f32 %v3575_v36, %v714_v56 }
 0x1f8   :  { %v1497_v32 = vpack.c.bf16 %v1453_v1, %v1452_v37  ;;  %v831_v37 = vadd.f32 %v767_v55, %v443_v44  ;;  %v1360_v2 = vadd.f32 %v3755_v58, %v1289_v43  ;;  %v4879_v55 = vld [vmem:[#allocation40_spill] sm:$0xff]  ;;  %v4882_v44 = vld [vmem:[#allocation66_spill] sm:$0xff] }
 0x1f9   :  { %v862_v3 = vadd.f32 %v798_v48, %v474_v62 }
 0x1fa   :  { %2708 = vmatmul.mubr.msk.bf16.gmra.mrb[20].mxu1 %vm1526_vm0, %v1497_v32  ;;  %v1424_v28 = vmax.f32 %v1360_v2, 0.0 }
 0x1fb   :  { %v966_v29 = vpop.permute.xlu1 %965  ;;  %v1250_v11 = vadd.f32 %v1186_v13, %v862_v3  ;;  %v4881_v13 = vld [vmem:[#allocation85_spill] sm:$0xff] }
 0x1fc   :  { %v1152_v61 = vmul.f32 %v3598_v38, %v966_v29  ;;  %v4166_v29 = vld [vmem:[%s4638_s2] ss:$0 sm:$0xff]  ;;  %v770_v41 = vmul.f32 %v3575_v36, %v4881_v13 }
 0x1fe   :  { %v1216_v54 = vadd.f32 %v1152_v61, %v828_v35 }
 0x1ff   :  { %v1094_v49 = vpop.permute.xlu1 %1093 }
 0x200   :  { %v1287_v10 = vmul.f32 %v3726_v21, %v1216_v54  ;;  %v1184_v16 = vmul.f32 %v3598_v38, %v1094_v49  ;;  %v4876_v54 = vld [vmem:[#allocation84_spill] sm:$0xff] }
 0x201   :  { %v769_v42 = vmul.f32 %v3575_v36, %v4876_v54 }
 0x202   :  { %v1358_v17 = vadd.f32 %v3755_v58, %v1287_v10  ;;  %v1248_v51 = vadd.f32 %v1184_v16, %v860_v14  ;;  %v4877_v14 = vld [vmem:[#allocation39_spill] sm:$0xff]  ;;  %v1157_v10 = vmul.f32 %v3598_v38, %v986_v20  ;;  %v4183_v16 = vld [vmem:[%s4639_s3] ss:$0 sm:$0xff] }
 0x203   :  { %v1098_v50 = vpop.permute.xlu1 %1097  ;;  %v445_v63 = vmul.f32 %v4835_v60, %v4877_v14 }
 0x204   :  { %v1422_v27 = vmax.f32 %v1358_v17, 0.0  ;;  %v1319_v45 = vmul.f32 %v3726_v21, %v1248_v51  ;;  %v1185_v59 = vmul.f32 %v3598_v38, %v1098_v50  ;;  %v4878_v17 = vld [vmem:[#allocation83_spill] sm:$0xff] }
 0x205   :  { %v768_v51 = vmul.f32 %v3575_v36, %v4878_v17  ;;  %v4889_v17 = vld [vmem:[#allocation67_spill] sm:$0xff] }
 0x206   :  { %v1249_v26 = vadd.f32 %v1185_v59, %v861_v7  ;;  %v1482_v24 = vpack.c.bf16 %v1423_v52, %v1422_v27  ;;  %v1390_v1 = vadd.f32 %v3755_v58, %v1319_v45  ;;  %v444_v52 = vmul.f32 %v4835_v60, %v4879_v55  ;;  %v4880_v7 = vld [vmem:[#allocation11_spill] sm:$0xff]  ;;  %v990_v45 = vpop.permute.xlu0 %989 }
 0x207   :  { %v978_v53 = vpop.permute.xlu1 %977  ;;  %v800_v27 = vmul.f32 %v3575_v36, %v4880_v7 }
 0x208   :  { %v1320_v56 = vmul.f32 %v3726_v21, %v1249_v26  ;;  %v1155_v40 = vmul.f32 %v3598_v38, %v978_v53  ;;  %2679 = vmatprep.mubr.msk.bf16.mxu0 %vm1526_vm0, %v1482_v24  ;;  %v1321_v21 = vmul.f32 %v4166_v29, %v1250_v11  ;;  %v1454_v6 = vmax.f32 %v1390_v1, 0.0 }
 0x209   :  { %v832_v50 = vadd.f32 %v768_v51, %v444_v52  ;;  %v476_v26 = vmul.f32 %v4835_v60, %v4882_v44  ;;  %v1158_v11 = vmul.f32 %v3598_v38, %v990_v45  ;;  %v479_v51 = vmul.f32 %v4835_v60, %v4889_v17 }
 0x20a   :  { %v1391_v32 = vadd.f32 %v3755_v58, %v1320_v56  ;;  %v1219_v12 = vadd.f32 %v1155_v40, %v831_v37  ;;  %v1392_v22 = vadd.f32 %v3755_v58, %v1321_v21  ;;  %v1118_v21 = vpop.permute.xlu0 %1117 }
 0x20b   :  { %v1106_v35 = vpop.permute.xlu1 %1105  ;;  %v864_v1 = vadd.f32 %v800_v27, %v476_v26 }
 0x20c   :  { %v1455_v39 = vmax.f32 %v1391_v32, 0.0  ;;  %v1290_v25 = vmul.f32 %v4166_v29, %v1219_v12  ;;  %v1187_v61 = vmul.f32 %v3598_v38, %v1106_v35  ;;  %v1456_v46 = vmax.f32 %v1392_v22, 0.0 }
 0x20d   :  { %v478_v32 = vmul.f32 %v4835_v60, %v4884_v30  ;;  %v834_v12 = vadd.f32 %v770_v41, %v446_v5  ;;  %v1190_v22 = vmul.f32 %v3598_v38, %v1118_v21 }
 0x20e   :  { %v1361_v33 = vadd.f32 %v3755_v58, %v1290_v25  ;;  %v1251_v34 = vadd.f32 %v1187_v61, %v863_v9  ;;  %v1498_v18 = vpack.c.bf16 %v1455_v39, %v1454_v6  ;;  %v833_v58 = vadd.f32 %v769_v42, %v445_v63  ;;  %v4885_v9 = vld [vmem:[#allocation65_spill] sm:$0xff]  ;;  %v4886_v39 = vld [vmem:[#allocation86_spill] sm:$0xff] }
 0x20f   :  { %v477_v2 = vmul.f32 %v4835_v60, %v4885_v9  ;;  %v771_v25 = vmul.f32 %v3575_v36, %v4886_v39  ;;  %v1222_v20 = vadd.f32 %v1158_v11, %v834_v12  ;;  %v4888_v63 = vld [vmem:[#allocation17_spill] sm:$0xff] }
 0x210   :  { %v1425_v23 = vmax.f32 %v1361_v33, 0.0  ;;  %v1322_v48 = vmul.f32 %v4166_v29, %v1251_v34  ;;  %v726_v49 = vpop.permute.xlu1 %725  ;;  %2711 = vmatprep.mubr.msk.bf16.mxu1 %vm1526_vm0, %v1498_v18  ;;  %v1221_v15 = vadd.f32 %v1157_v10, %v833_v58  ;;  %v803_v10 = vmul.f32 %v3575_v36, %v4888_v63 }
 0x211   :  { %v801_v56 = vmul.f32 %v3575_v36, %v726_v49 }
 0x212   :  { %v1393_v0 = vadd.f32 %v4183_v16, %v1322_v48  ;;  %v1483_v62 = vpack.c.bf16 %v1425_v23, %v1424_v28  ;;  %v1292_v8 = vmul.f32 %v4166_v29, %v1221_v15  ;;  %v4887_v23 = vld [vmem:[#allocation41_spill] sm:$0xff] }
 0x213   :  { %v865_v18 = vadd.f32 %v801_v56, %v477_v2  ;;  %v447_v48 = vmul.f32 %v4835_v60, %v4887_v23 }
 0x214   :  { %v1457_v19 = vmax.f32 %v1393_v0, 0.0  ;;  %v730_v57 = vpop.permute.xlu1 %729  ;;  %2680 = vmatmul.mubr.msk.bf16.gmra.mrb[24].mxu0 %vm1526_vm0, %v1483_v62  ;;  %v1363_v43 = vadd.f32 %v4183_v16, %v1292_v8  ;;  %v1293_v0 = vmul.f32 %v4166_v29, %v1222_v20 }
 0x215   :  { %v802_v53 = vmul.f32 %v3575_v36, %v730_v57  ;;  %v867_v36 = vadd.f32 %v803_v10, %v479_v51 }
 0x216   :  { %v1499_v31 = vpack.c.bf16 %v1457_v19, %v1456_v46  ;;  %v1427_v61 = vmax.f32 %v1363_v43, 0.0  ;;  %v835_v46 = vadd.f32 %v771_v25, %v447_v48  ;;  %v1364_v52 = vadd.f32 %v4183_v16, %v1293_v0 }
 0x217   :  { %v866_v33 = vadd.f32 %v802_v53, %v478_v32  ;;  %v4244_v53 = vld [vmem:[%s4640_s5] ss:$0 sm:$0xff] }
 0x218   :  { %2712 = vmatmul.mubr.msk.bf16.gmra.mrb[24].mxu1 %vm1526_vm0, %v1499_v31  ;;  %v1428_v60 = vmax.f32 %v1364_v52, 0.0 }
 0x219   :  { %v982_v3 = vpop.permute.xlu1 %981  ;;  %v1254_v62 = vadd.f32 %v1190_v22, %v866_v33 }
 0x21a   :  { %v1156_v59 = vmul.f32 %v3598_v38, %v982_v3 }
 0x21b   :  { %v1325_v8 = vmul.f32 %v4166_v29, %v1254_v62 }
 0x21c   :  { %v1220_v24 = vadd.f32 %v1156_v59, %v832_v50 }
 0x21d   :  { %v1110_v37 = vpop.permute.xlu1 %1109  ;;  %v1396_v44 = vadd.f32 %v4183_v16, %v1325_v8 }
 0x21e   :  { %v1291_v40 = vmul.f32 %v4166_v29, %v1220_v24  ;;  %v1188_v4 = vmul.f32 %v3598_v38, %v1110_v37 }
 0x21f   :  { %v1460_v43 = vmax.f32 %v1396_v44, 0.0 }
 0x220   :  { %v1362_v35 = vadd.f32 %v4183_v16, %v1291_v40  ;;  %v1252_v6 = vadd.f32 %v1188_v4, %v864_v1 }
 0x221   :  { %v1114_v34 = vpop.permute.xlu1 %1113 }
 0x222   :  { %v1426_v54 = vmax.f32 %v1362_v35, 0.0  ;;  %v1323_v42 = vmul.f32 %v4166_v29, %v1252_v6  ;;  %v1189_v28 = vmul.f32 %v3598_v38, %v1114_v34 }
 0x224   :  { %v1253_v49 = vadd.f32 %v1189_v28, %v865_v18  ;;  %v1484_v14 = vpack.c.bf16 %v1427_v61, %v1426_v54  ;;  %v1394_v19 = vadd.f32 %v4183_v16, %v1323_v42 }
 0x225   :  { %v994_v58 = vpop.permute.xlu1 %993 }
 0x226   :  { %v1324_v57 = vmul.f32 %v4166_v29, %v1253_v49  ;;  %v1159_v15 = vmul.f32 %v3598_v38, %v994_v58  ;;  %2683 = vmatprep.mubr.msk.bf16.mxu0 %vm1526_vm0, %v1484_v14  ;;  %v1458_v50 = vmax.f32 %v1394_v19, 0.0 }
 0x228   :  { %v1395_v31 = vadd.f32 %v4183_v16, %v1324_v57  ;;  %v1223_v55 = vadd.f32 %v1159_v15, %v835_v46 }
 0x229   :  { %v1122_v3 = vpop.permute.xlu1 %1121 }
 0x22a   :  { %v1459_v7 = vmax.f32 %v1395_v31, 0.0  ;;  %v1294_v27 = vmul.f32 %v4166_v29, %v1223_v55  ;;  %v1191_v45 = vmul.f32 %v3598_v38, %v1122_v3 }
 0x22c   :  { %v1365_v59 = vadd.f32 %v4183_v16, %v1294_v27  ;;  %v1255_v13 = vadd.f32 %v1191_v45, %v867_v36  ;;  %v1500_v41 = vpack.c.bf16 %v1459_v7, %v1458_v50 }
 0x22e   :  { %v1429_v26 = vmax.f32 %v1365_v59, 0.0  ;;  %v1326_v24 = vmul.f32 %v4166_v29, %v1255_v13  ;;  %2715 = vmatprep.mubr.msk.bf16.mxu1 %vm1526_vm0, %v1500_v41  ;;  %v4249_v29 = vld [vmem:[%s4641_s6] ss:$0 sm:$0xff] }
 0x230   :  { %v1397_v47 = vadd.f32 %v4183_v16, %v1326_v24  ;;  %v1485_v5 = vpack.c.bf16 %v1429_v26, %v1428_v60 }
 0x232   :  { %v1461_v11 = vmax.f32 %v1397_v47, 0.0  ;;  %2684 = vmatmul.mubr.msk.bf16.gmra.mrb[28].mxu0 %vm1526_vm0, %v1485_v5 }
 0x234   :  { %v1501_v38 = vpack.c.bf16 %v1461_v11, %v1460_v43 }
 0x236   :  { %2716 = vmatmul.mubr.msk.bf16.gmra.mrb[28].mxu1 %vm1526_vm0, %v1501_v38 }
 0x267   :  { %v2657_v37 = vpop.f32.mrb[0].mxu0 }
 0x268   :  { %v1921_v16 = vmul.f32 %v2657_v37, %v4244_v53  ;;  %v1657_v1 = vpop.f32.mrb[1].mxu0 }
 0x269   :  { %v1919_v56 = vmul.f32 %v4244_v53, %v1657_v1  ;;  %v2658_v40 = vpop.f32.mrb[2].mxu0 }
 0x26a   :  { %v1992_v4 = vadd.f32 %v4249_v29, %v1921_v16  ;;  %v1922_v30 = vmul.f32 %v2658_v40, %v4244_v53  ;;  %v1660_v32 = vpop.f32.mrb[3].mxu0 }
 0x26b   :  { %v1990_v12 = vadd.f32 %v4249_v29, %v1919_v56  ;;  %v1920_v9 = vmul.f32 %v4244_v53, %v1660_v32  ;;  %v2689_v35 = vpop.f32.mrb[0].mxu1 }
 0x26c   :  { %v2056_v2 = vmax.f32 %v1992_v4, 0.0  ;;  %v1993_v21 = vadd.f32 %v4249_v29, %v1922_v30  ;;  %v1953_v25 = vmul.f32 %v2689_v35, %v4244_v53  ;;  %v1785_v61 = vpop.f32.mrb[1].mxu1 }
 0x26d   :  { %v2054_v6 = vmax.f32 %v1990_v12, 0.0  ;;  %v1991_v39 = vadd.f32 %v4249_v29, %v1920_v9  ;;  %v1951_v34 = vmul.f32 %v4244_v53, %v1785_v61  ;;  %v2690_v18 = vpop.f32.mrb[2].mxu1 }
 0x26e   :  { %v2549_v20 = vpack.c.bf16 %v2056_v2, %v2056_v2  ;;  %v2057_v33 = vmax.f32 %v1993_v21, 0.0  ;;  %v2024_v28 = vadd.f32 %v4249_v29, %v1953_v25  ;;  %v1954_v22 = vmul.f32 %v2690_v18, %v4244_v53  ;;  %v1788_v23 = vpop.f32.mrb[3].mxu1 }
 0x26f   :  { %v2547_v54 = vpack.c.bf16 %v2054_v6, %v2054_v6  ;;  %v2055_v42 = vmax.f32 %v1991_v39, 0.0  ;;  %v2022_v49 = vadd.f32 %v4249_v29, %v1951_v34  ;;  %v1952_v14 = vmul.f32 %v4244_v53, %v1788_v23 }
 0x270   :  { %2377 = vst.msk [vmem:[%s4642_s7 + $0x8] sm:$0xf] %vm2374_vm1, %v2549_v20  ;;  %v2550_v48 = vpack.c.bf16 %v2057_v33, %v2057_v33  ;;  %v2088_v10 = vmax.f32 %v2024_v28, 0.0  ;;  %v2025_v0 = vadd.f32 %v4249_v29, %v1954_v22 }
 0x271   :  { %2375 = vst.msk [vmem:[%s4642_s7] sm:$0xf] %vm2374_vm1, %v2547_v54  ;;  %v2548_v63 = vpack.c.bf16 %v2055_v42, %v2055_v42  ;;  %v2086_v62 = vmax.f32 %v2022_v49, 0.0  ;;  %v2023_v58 = vadd.f32 %v4249_v29, %v1952_v14 }
 0x272   :  { %2378 = vst.msk [vmem:[%s4642_s7 + $0xc] sm:$0xf] %vm2374_vm1, %v2550_v48  ;;  %v2581_v46 = vpack.c.bf16 %v2088_v10, %v2088_v10  ;;  %v2089_v19 = vmax.f32 %v2025_v0, 0.0 }
 0x273   :  { %2376 = vst.msk [vmem:[%s4642_s7 + $0x4] sm:$0xf] %vm2374_vm1, %v2548_v63  ;;  %v2579_v57 = vpack.c.bf16 %v2086_v62, %v2086_v62  ;;  %v2087_v15 = vmax.f32 %v2023_v58, 0.0 }
 0x274   :  { %2409 = vst.msk [vmem:[%s4642_s7 + $0x88] sm:$0xf] %vm2374_vm1, %v2581_v46  ;;  %v2582_v17 = vpack.c.bf16 %v2089_v19, %v2089_v19 }
 0x275   :  { %2407 = vst.msk [vmem:[%s4642_s7 + $0x80] sm:$0xf] %vm2374_vm1, %v2579_v57  ;;  %v2580_v51 = vpack.c.bf16 %v2087_v15, %v2087_v15 }
 0x276   :  { %2410 = vst.msk [vmem:[%s4642_s7 + $0x8c] sm:$0xf] %vm2374_vm1, %v2582_v17 }
 0x277   :  { %v2661_v31 = vpop.f32.mrb[4].mxu0  ;;  %2408 = vst.msk [vmem:[%s4642_s7 + $0x84] sm:$0xf] %vm2374_vm1, %v2580_v51 }
 0x278   :  { %v1925_v55 = vmul.f32 %v2661_v31, %v4244_v53  ;;  %v1673_v36 = vpop.f32.mrb[5].mxu0 }
 0x279   :  { %v1923_v52 = vmul.f32 %v4244_v53, %v1673_v36  ;;  %v2662_v8 = vpop.f32.mrb[6].mxu0 }
 0x27a   :  { %v1996_v3 = vadd.f32 %v4249_v29, %v1925_v55  ;;  %v1926_v50 = vmul.f32 %v2662_v8, %v4244_v53  ;;  %v1676_v7 = vpop.f32.mrb[7].mxu0 }
 0x27b   :  { %v1994_v27 = vadd.f32 %v4249_v29, %v1923_v52  ;;  %v1924_v45 = vmul.f32 %v4244_v53, %v1676_v7  ;;  %v2693_v41 = vpop.f32.mrb[4].mxu1 }
 0x27c   :  { %v2060_v59 = vmax.f32 %v1996_v3, 0.0  ;;  %v1997_v13 = vadd.f32 %v4249_v29, %v1926_v50  ;;  %v1957_v26 = vmul.f32 %v2693_v41, %v4244_v53  ;;  %v1801_v24 = vpop.f32.mrb[5].mxu1 }
 0x27d   :  { %v2058_v60 = vmax.f32 %v1994_v27, 0.0  ;;  %v1995_v44 = vadd.f32 %v4249_v29, %v1924_v45  ;;  %v1955_v43 = vmul.f32 %v4244_v53, %v1801_v24  ;;  %v2694_v11 = vpop.f32.mrb[6].mxu1 }
 0x27e   :  { %v2553_v47 = vpack.c.bf16 %v2060_v59, %v2060_v59  ;;  %v2061_v5 = vmax.f32 %v1997_v13, 0.0  ;;  %v2028_v16 = vadd.f32 %v4249_v29, %v1957_v26  ;;  %v1958_v1 = vmul.f32 %v2694_v11, %v4244_v53  ;;  %v1804_v56 = vpop.f32.mrb[7].mxu1 }
 0x27f   :  { %v2551_v38 = vpack.c.bf16 %v2058_v60, %v2058_v60  ;;  %v2059_v37 = vmax.f32 %v1995_v44, 0.0  ;;  %v2026_v4 = vadd.f32 %v4249_v29, %v1955_v43  ;;  %v1956_v30 = vmul.f32 %v4244_v53, %v1804_v56 }
 0x280   :  { %2381 = vst.msk [vmem:[%s4642_s7 + $0x18] sm:$0xf] %vm2374_vm1, %v2553_v47  ;;  %v2554_v40 = vpack.c.bf16 %v2061_v5, %v2061_v5  ;;  %v2092_v12 = vmax.f32 %v2028_v16, 0.0  ;;  %v2029_v9 = vadd.f32 %v4249_v29, %v1958_v1 }
 0x281   :  { %2379 = vst.msk [vmem:[%s4642_s7 + $0x10] sm:$0xf] %vm2374_vm1, %v2551_v38  ;;  %v2552_v32 = vpack.c.bf16 %v2059_v37, %v2059_v37  ;;  %v2090_v2 = vmax.f32 %v2026_v4, 0.0  ;;  %v2027_v21 = vadd.f32 %v4249_v29, %v1956_v30 }
 0x282   :  { %2382 = vst.msk [vmem:[%s4642_s7 + $0x1c] sm:$0xf] %vm2374_vm1, %v2554_v40  ;;  %v2585_v35 = vpack.c.bf16 %v2092_v12, %v2092_v12  ;;  %v2093_v6 = vmax.f32 %v2029_v9, 0.0 }
 0x283   :  { %2380 = vst.msk [vmem:[%s4642_s7 + $0x14] sm:$0xf] %vm2374_vm1, %v2552_v32  ;;  %v2583_v39 = vpack.c.bf16 %v2090_v2, %v2090_v2  ;;  %v2091_v25 = vmax.f32 %v2027_v21, 0.0 }
 0x284   :  { %v2665_v61 = vpop.f32.mrb[8].mxu0  ;;  %2413 = vst.msk [vmem:[%s4642_s7 + $0x98] sm:$0xf] %vm2374_vm1, %v2585_v35  ;;  %v2586_v20 = vpack.c.bf16 %v2093_v6, %v2093_v6 }
 0x285   :  { %v1929_v33 = vmul.f32 %v2665_v61, %v4244_v53  ;;  %v1689_v34 = vpop.f32.mrb[9].mxu0  ;;  %2411 = vst.msk [vmem:[%s4642_s7 + $0x90] sm:$0xf] %vm2374_vm1, %v2583_v39  ;;  %v2584_v18 = vpack.c.bf16 %v2091_v25, %v2091_v25 }
 0x286   :  { %v1927_v54 = vmul.f32 %v4244_v53, %v1689_v34  ;;  %v2666_v42 = vpop.f32.mrb[10].mxu0  ;;  %2414 = vst.msk [vmem:[%s4642_s7 + $0x9c] sm:$0xf] %vm2374_vm1, %v2586_v20 }
 0x287   :  { %v2000_v28 = vadd.f32 %v4249_v29, %v1929_v33  ;;  %v1930_v22 = vmul.f32 %v2666_v42, %v4244_v53  ;;  %v1692_v23 = vpop.f32.mrb[11].mxu0  ;;  %2412 = vst.msk [vmem:[%s4642_s7 + $0x94] sm:$0xf] %vm2374_vm1, %v2584_v18 }
 0x288   :  { %v1998_v48 = vadd.f32 %v4249_v29, %v1927_v54  ;;  %v1928_v49 = vmul.f32 %v4244_v53, %v1692_v23  ;;  %v2697_v14 = vpop.f32.mrb[8].mxu1 }
 0x289   :  { %v2064_v63 = vmax.f32 %v2000_v28, 0.0  ;;  %v2001_v10 = vadd.f32 %v4249_v29, %v1930_v22  ;;  %v1961_v0 = vmul.f32 %v2697_v14, %v4244_v53  ;;  %v1817_v62 = vpop.f32.mrb[9].mxu1 }
 0x28a   :  { %v2062_v58 = vmax.f32 %v1998_v48, 0.0  ;;  %v1999_v46 = vadd.f32 %v4249_v29, %v1928_v49  ;;  %v1959_v19 = vmul.f32 %v4244_v53, %v1817_v62  ;;  %v2698_v57 = vpop.f32.mrb[10].mxu1 }
 0x28b   :  { %v2557_v15 = vpack.c.bf16 %v2064_v63, %v2064_v63  ;;  %v2065_v17 = vmax.f32 %v2001_v10, 0.0  ;;  %v2032_v51 = vadd.f32 %v4249_v29, %v1961_v0  ;;  %v1962_v31 = vmul.f32 %v2698_v57, %v4244_v53  ;;  %v1820_v55 = vpop.f32.mrb[11].mxu1 }
 0x28c   :  { %v2555_v36 = vpack.c.bf16 %v2062_v58, %v2062_v58  ;;  %v2063_v52 = vmax.f32 %v1999_v46, 0.0  ;;  %v2030_v8 = vadd.f32 %v4249_v29, %v1959_v19  ;;  %v1960_v3 = vmul.f32 %v4244_v53, %v1820_v55 }
 0x28d   :  { %2385 = vst.msk [vmem:[%s4642_s7 + $0x28] sm:$0xf] %vm2374_vm1, %v2557_v15  ;;  %v2558_v50 = vpack.c.bf16 %v2065_v17, %v2065_v17  ;;  %v2096_v7 = vmax.f32 %v2032_v51, 0.0  ;;  %v2033_v27 = vadd.f32 %v4249_v29, %v1962_v31 }
 0x28e   :  { %2383 = vst.msk [vmem:[%s4642_s7 + $0x20] sm:$0xf] %vm2374_vm1, %v2555_v36  ;;  %v2556_v45 = vpack.c.bf16 %v2063_v52, %v2063_v52  ;;  %v2094_v59 = vmax.f32 %v2030_v8, 0.0  ;;  %v2031_v13 = vadd.f32 %v4249_v29, %v1960_v3 }
 0x28f   :  { %2386 = vst.msk [vmem:[%s4642_s7 + $0x2c] sm:$0xf] %vm2374_vm1, %v2558_v50  ;;  %v2589_v41 = vpack.c.bf16 %v2096_v7, %v2096_v7  ;;  %v2097_v60 = vmax.f32 %v2033_v27, 0.0  ;;  %v2669_v44 = vpop.f32.mrb[12].mxu0 }
 0x290   :  { %2384 = vst.msk [vmem:[%s4642_s7 + $0x24] sm:$0xf] %vm2374_vm1, %v2556_v45  ;;  %v2587_v26 = vpack.c.bf16 %v2094_v59, %v2094_v59  ;;  %v2095_v24 = vmax.f32 %v2031_v13, 0.0  ;;  %v1933_v47 = vmul.f32 %v2669_v44, %v4244_v53  ;;  %v1705_v5 = vpop.f32.mrb[13].mxu0 }
 0x291   :  { %2417 = vst.msk [vmem:[%s4642_s7 + $0xa8] sm:$0xf] %vm2374_vm1, %v2589_v41  ;;  %v2590_v43 = vpack.c.bf16 %v2097_v60, %v2097_v60  ;;  %v1931_v11 = vmul.f32 %v4244_v53, %v1705_v5  ;;  %v2670_v38 = vpop.f32.mrb[14].mxu0 }
 0x292   :  { %2415 = vst.msk [vmem:[%s4642_s7 + $0xa0] sm:$0xf] %vm2374_vm1, %v2587_v26  ;;  %v2588_v37 = vpack.c.bf16 %v2095_v24, %v2095_v24  ;;  %v2004_v16 = vadd.f32 %v4249_v29, %v1933_v47  ;;  %v1934_v1 = vmul.f32 %v2670_v38, %v4244_v53  ;;  %v1708_v56 = vpop.f32.mrb[15].mxu0 }
 0x293   :  { %2418 = vst.msk [vmem:[%s4642_s7 + $0xac] sm:$0xf] %vm2374_vm1, %v2590_v43  ;;  %v2002_v40 = vadd.f32 %v4249_v29, %v1931_v11  ;;  %v1932_v4 = vmul.f32 %v4244_v53, %v1708_v56  ;;  %v2701_v30 = vpop.f32.mrb[12].mxu1 }
 0x294   :  { %2416 = vst.msk [vmem:[%s4642_s7 + $0xa4] sm:$0xf] %vm2374_vm1, %v2588_v37  ;;  %v2068_v32 = vmax.f32 %v2004_v16, 0.0  ;;  %v2005_v12 = vadd.f32 %v4249_v29, %v1934_v1  ;;  %v1965_v9 = vmul.f32 %v2701_v30, %v4244_v53  ;;  %v1833_v2 = vpop.f32.mrb[13].mxu1 }
 0x295   :  { %v2066_v21 = vmax.f32 %v2002_v40, 0.0  ;;  %v2003_v35 = vadd.f32 %v4249_v29, %v1932_v4  ;;  %v1963_v6 = vmul.f32 %v4244_v53, %v1833_v2  ;;  %v2702_v39 = vpop.f32.mrb[14].mxu1 }
 0x296   :  { %v2561_v25 = vpack.c.bf16 %v2068_v32, %v2068_v32  ;;  %v2069_v61 = vmax.f32 %v2005_v12, 0.0  ;;  %v2036_v20 = vadd.f32 %v4249_v29, %v1965_v9  ;;  %v1966_v33 = vmul.f32 %v2702_v39, %v4244_v53  ;;  %v1836_v34 = vpop.f32.mrb[15].mxu1 }
 0x297   :  { %v2559_v18 = vpack.c.bf16 %v2066_v21, %v2066_v21  ;;  %v2067_v54 = vmax.f32 %v2003_v35, 0.0  ;;  %v2034_v42 = vadd.f32 %v4249_v29, %v1963_v6  ;;  %v1964_v28 = vmul.f32 %v4244_v53, %v1836_v34 }
 0x298   :  { %2389 = vst.msk [vmem:[%s4642_s7 + $0x38] sm:$0xf] %vm2374_vm1, %v2561_v25  ;;  %v2562_v22 = vpack.c.bf16 %v2069_v61, %v2069_v61  ;;  %v2100_v23 = vmax.f32 %v2036_v20, 0.0  ;;  %v2037_v48 = vadd.f32 %v4249_v29, %v1966_v33 }
 0x299   :  { %2387 = vst.msk [vmem:[%s4642_s7 + $0x30] sm:$0xf] %vm2374_vm1, %v2559_v18  ;;  %v2560_v49 = vpack.c.bf16 %v2067_v54, %v2067_v54  ;;  %v2098_v14 = vmax.f32 %v2034_v42, 0.0  ;;  %v2035_v63 = vadd.f32 %v4249_v29, %v1964_v28 }
 0x29a   :  { %2390 = vst.msk [vmem:[%s4642_s7 + $0x3c] sm:$0xf] %vm2374_vm1, %v2562_v22  ;;  %v2593_v10 = vpack.c.bf16 %v2100_v23, %v2100_v23  ;;  %v2101_v0 = vmax.f32 %v2037_v48, 0.0 }
 0x29b   :  { %2388 = vst.msk [vmem:[%s4642_s7 + $0x34] sm:$0xf] %vm2374_vm1, %v2560_v49  ;;  %v2591_v62 = vpack.c.bf16 %v2098_v14, %v2098_v14  ;;  %v2099_v58 = vmax.f32 %v2035_v63, 0.0 }
 0x29c   :  { %2421 = vst.msk [vmem:[%s4642_s7 + $0xb8] sm:$0xf] %vm2374_vm1, %v2593_v10  ;;  %v2594_v46 = vpack.c.bf16 %v2101_v0, %v2101_v0 }
 0x29d   :  { %2419 = vst.msk [vmem:[%s4642_s7 + $0xb0] sm:$0xf] %vm2374_vm1, %v2591_v62  ;;  %v2592_v19 = vpack.c.bf16 %v2099_v58, %v2099_v58 }
 0x29e   :  { %2422 = vst.msk [vmem:[%s4642_s7 + $0xbc] sm:$0xf] %vm2374_vm1, %v2594_v46 }
 0x29f   :  { %2420 = vst.msk [vmem:[%s4642_s7 + $0xb4] sm:$0xf] %vm2374_vm1, %v2592_v19 }
 0x2ab   :  { %v2673_v57 = vpop.f32.mrb[16].mxu0 }
 0x2ac   :  { %v1937_v15 = vmul.f32 %v2673_v57, %v4244_v53  ;;  %v1721_v17 = vpop.f32.mrb[17].mxu0 }
 0x2ad   :  { %v1935_v51 = vmul.f32 %v4244_v53, %v1721_v17  ;;  %v2674_v31 = vpop.f32.mrb[18].mxu0 }
 0x2ae   :  { %v2008_v55 = vadd.f32 %v4249_v29, %v1937_v15  ;;  %v1938_v36 = vmul.f32 %v2674_v31, %v4244_v53  ;;  %v1724_v52 = vpop.f32.mrb[19].mxu0 }
 0x2af   :  { %v2006_v8 = vadd.f32 %v4249_v29, %v1935_v51  ;;  %v1936_v3 = vmul.f32 %v4244_v53, %v1724_v52  ;;  %v2705_v50 = vpop.f32.mrb[16].mxu1 }
 0x2b0   :  { %v2072_v7 = vmax.f32 %v2008_v55, 0.0  ;;  %v2009_v27 = vadd.f32 %v4249_v29, %v1938_v36  ;;  %v1969_v45 = vmul.f32 %v2705_v50, %v4244_v53  ;;  %v1849_v59 = vpop.f32.mrb[17].mxu1 }
 0x2b1   :  { %v2070_v13 = vmax.f32 %v2006_v8, 0.0  ;;  %v2007_v41 = vadd.f32 %v4249_v29, %v1936_v3  ;;  %v1967_v60 = vmul.f32 %v4244_v53, %v1849_v59  ;;  %v2706_v44 = vpop.f32.mrb[18].mxu1 }
 0x2b2   :  { %v2565_v26 = vpack.c.bf16 %v2072_v7, %v2072_v7  ;;  %v2073_v24 = vmax.f32 %v2009_v27, 0.0  ;;  %v2040_v47 = vadd.f32 %v4249_v29, %v1969_v45  ;;  %v1970_v5 = vmul.f32 %v2706_v44, %v4244_v53  ;;  %v1852_v43 = vpop.f32.mrb[19].mxu1 }
 0x2b3   :  { %v2563_v11 = vpack.c.bf16 %v2070_v13, %v2070_v13  ;;  %v2071_v38 = vmax.f32 %v2007_v41, 0.0  ;;  %v2038_v37 = vadd.f32 %v4249_v29, %v1967_v60  ;;  %v1968_v16 = vmul.f32 %v4244_v53, %v1852_v43 }
 0x2b4   :  { %2393 = vst.msk [vmem:[%s4642_s7 + $0x48] sm:$0xf] %vm2374_vm1, %v2565_v26  ;;  %v2566_v1 = vpack.c.bf16 %v2073_v24, %v2073_v24  ;;  %v2104_v56 = vmax.f32 %v2040_v47, 0.0  ;;  %v2041_v40 = vadd.f32 %v4249_v29, %v1970_v5 }
 0x2b5   :  { %2391 = vst.msk [vmem:[%s4642_s7 + $0x40] sm:$0xf] %vm2374_vm1, %v2563_v11  ;;  %v2564_v4 = vpack.c.bf16 %v2071_v38, %v2071_v38  ;;  %v2102_v30 = vmax.f32 %v2038_v37, 0.0  ;;  %v2039_v32 = vadd.f32 %v4249_v29, %v1968_v16 }
 0x2b6   :  { %2394 = vst.msk [vmem:[%s4642_s7 + $0x4c] sm:$0xf] %vm2374_vm1, %v2566_v1  ;;  %v2597_v12 = vpack.c.bf16 %v2104_v56, %v2104_v56  ;;  %v2105_v9 = vmax.f32 %v2041_v40, 0.0 }
 0x2b7   :  { %2392 = vst.msk [vmem:[%s4642_s7 + $0x44] sm:$0xf] %vm2374_vm1, %v2564_v4  ;;  %v2595_v2 = vpack.c.bf16 %v2102_v30, %v2102_v30  ;;  %v2103_v21 = vmax.f32 %v2039_v32, 0.0 }
 0x2b8   :  { %2425 = vst.msk [vmem:[%s4642_s7 + $0xc8] sm:$0xf] %vm2374_vm1, %v2597_v12  ;;  %v2598_v35 = vpack.c.bf16 %v2105_v9, %v2105_v9 }
 0x2b9   :  { %2423 = vst.msk [vmem:[%s4642_s7 + $0xc0] sm:$0xf] %vm2374_vm1, %v2595_v2  ;;  %v2596_v6 = vpack.c.bf16 %v2103_v21, %v2103_v21 }
 0x2ba   :  { %2426 = vst.msk [vmem:[%s4642_s7 + $0xcc] sm:$0xf] %vm2374_vm1, %v2598_v35 }
 0x2bb   :  { %2424 = vst.msk [vmem:[%s4642_s7 + $0xc4] sm:$0xf] %vm2374_vm1, %v2596_v6 }
 0x2c9   :  { %v2677_v39 = vpop.f32.mrb[20].mxu0 }
 0x2ca   :  { %v1941_v25 = vmul.f32 %v2677_v39, %v4244_v53  ;;  %v1737_v61 = vpop.f32.mrb[21].mxu0 }
 0x2cb   :  { %v1939_v20 = vmul.f32 %v4244_v53, %v1737_v61  ;;  %v2678_v33 = vpop.f32.mrb[22].mxu0 }
 0x2cc   :  { %v2012_v34 = vadd.f32 %v4249_v29, %v1941_v25  ;;  %v1942_v18 = vmul.f32 %v2678_v33, %v4244_v53  ;;  %v1740_v54 = vpop.f32.mrb[23].mxu0 }
 0x2cd   :  { %v2010_v42 = vadd.f32 %v4249_v29, %v1939_v20  ;;  %v1940_v28 = vmul.f32 %v4244_v53, %v1740_v54  ;;  %v2709_v22 = vpop.f32.mrb[20].mxu1 }
 0x2ce   :  { %v2076_v23 = vmax.f32 %v2012_v34, 0.0  ;;  %v2013_v48 = vadd.f32 %v4249_v29, %v1942_v18  ;;  %v1973_v49 = vmul.f32 %v2709_v22, %v4244_v53  ;;  %v1865_v14 = vpop.f32.mrb[21].mxu1 }
 0x2cf   :  { %v2074_v63 = vmax.f32 %v2010_v42, 0.0  ;;  %v2011_v10 = vadd.f32 %v4249_v29, %v1940_v28  ;;  %v1971_v0 = vmul.f32 %v4244_v53, %v1865_v14  ;;  %v2710_v62 = vpop.f32.mrb[22].mxu1 }
 0x2d0   :  { %v2569_v58 = vpack.c.bf16 %v2076_v23, %v2076_v23  ;;  %v2077_v46 = vmax.f32 %v2013_v48, 0.0  ;;  %v2044_v19 = vadd.f32 %v4249_v29, %v1973_v49  ;;  %v1974_v57 = vmul.f32 %v2710_v62, %v4244_v53  ;;  %v1868_v15 = vpop.f32.mrb[23].mxu1 }
 0x2d1   :  { %v2567_v17 = vpack.c.bf16 %v2074_v63, %v2074_v63  ;;  %v2075_v51 = vmax.f32 %v2011_v10, 0.0  ;;  %v2042_v31 = vadd.f32 %v4249_v29, %v1971_v0  ;;  %v1972_v55 = vmul.f32 %v4244_v53, %v1868_v15 }
 0x2d2   :  { %2397 = vst.msk [vmem:[%s4642_s7 + $0x58] sm:$0xf] %vm2374_vm1, %v2569_v58  ;;  %v2570_v36 = vpack.c.bf16 %v2077_v46, %v2077_v46  ;;  %v2108_v52 = vmax.f32 %v2044_v19, 0.0  ;;  %v2045_v8 = vadd.f32 %v4249_v29, %v1974_v57 }
 0x2d3   :  { %2395 = vst.msk [vmem:[%s4642_s7 + $0x50] sm:$0xf] %vm2374_vm1, %v2567_v17  ;;  %v2568_v3 = vpack.c.bf16 %v2075_v51, %v2075_v51  ;;  %v2106_v50 = vmax.f32 %v2042_v31, 0.0  ;;  %v2043_v7 = vadd.f32 %v4249_v29, %v1972_v55 }
 0x2d4   :  { %2398 = vst.msk [vmem:[%s4642_s7 + $0x5c] sm:$0xf] %vm2374_vm1, %v2570_v36  ;;  %v2601_v27 = vpack.c.bf16 %v2108_v52, %v2108_v52  ;;  %v2109_v45 = vmax.f32 %v2045_v8, 0.0 }
 0x2d5   :  { %2396 = vst.msk [vmem:[%s4642_s7 + $0x54] sm:$0xf] %vm2374_vm1, %v2568_v3  ;;  %v2599_v59 = vpack.c.bf16 %v2106_v50, %v2106_v50  ;;  %v2107_v13 = vmax.f32 %v2043_v7, 0.0 }
 0x2d6   :  { %2429 = vst.msk [vmem:[%s4642_s7 + $0xd8] sm:$0xf] %vm2374_vm1, %v2601_v27  ;;  %v2602_v41 = vpack.c.bf16 %v2109_v45, %v2109_v45 }
 0x2d7   :  { %2427 = vst.msk [vmem:[%s4642_s7 + $0xd0] sm:$0xf] %vm2374_vm1, %v2599_v59  ;;  %v2600_v60 = vpack.c.bf16 %v2107_v13, %v2107_v13 }
 0x2d8   :  { %2430 = vst.msk [vmem:[%s4642_s7 + $0xdc] sm:$0xf] %vm2374_vm1, %v2602_v41 }
 0x2d9   :  { %2428 = vst.msk [vmem:[%s4642_s7 + $0xd4] sm:$0xf] %vm2374_vm1, %v2600_v60 }
 0x2e7   :  { %v2681_v44 = vpop.f32.mrb[24].mxu0 }
 0x2e8   :  { %v1945_v26 = vmul.f32 %v2681_v44, %v4244_v53  ;;  %v1753_v24 = vpop.f32.mrb[25].mxu0 }
 0x2e9   :  { %v1943_v47 = vmul.f32 %v4244_v53, %v1753_v24  ;;  %v2682_v5 = vpop.f32.mrb[26].mxu0 }
 0x2ea   :  { %v2016_v43 = vadd.f32 %v4249_v29, %v1945_v26  ;;  %v1946_v11 = vmul.f32 %v2682_v5, %v4244_v53  ;;  %v1756_v38 = vpop.f32.mrb[27].mxu0 }
 0x2eb   :  { %v2014_v37 = vadd.f32 %v4249_v29, %v1943_v47  ;;  %v1944_v16 = vmul.f32 %v4244_v53, %v1756_v38  ;;  %v2713_v1 = vpop.f32.mrb[24].mxu1 }
 0x2ec   :  { %v2080_v56 = vmax.f32 %v2016_v43, 0.0  ;;  %v2017_v40 = vadd.f32 %v4249_v29, %v1946_v11  ;;  %v1977_v4 = vmul.f32 %v2713_v1, %v4244_v53  ;;  %v1881_v30 = vpop.f32.mrb[25].mxu1 }
 0x2ed   :  { %v2078_v32 = vmax.f32 %v2014_v37, 0.0  ;;  %v2015_v12 = vadd.f32 %v4249_v29, %v1944_v16  ;;  %v1975_v9 = vmul.f32 %v4244_v53, %v1881_v30  ;;  %v2714_v2 = vpop.f32.mrb[26].mxu1 }
 0x2ee   :  { %v2573_v21 = vpack.c.bf16 %v2080_v56, %v2080_v56  ;;  %v2081_v35 = vmax.f32 %v2017_v40, 0.0  ;;  %v2048_v6 = vadd.f32 %v4249_v29, %v1977_v4  ;;  %v1978_v39 = vmul.f32 %v2714_v2, %v4244_v53  ;;  %v1884_v25 = vpop.f32.mrb[27].mxu1 }
 0x2ef   :  { %v2571_v61 = vpack.c.bf16 %v2078_v32, %v2078_v32  ;;  %v2079_v20 = vmax.f32 %v2015_v12, 0.0  ;;  %v2046_v33 = vadd.f32 %v4249_v29, %v1975_v9  ;;  %v1976_v34 = vmul.f32 %v4244_v53, %v1884_v25 }
 0x2f0   :  { %2401 = vst.msk [vmem:[%s4642_s7 + $0x68] sm:$0xf] %vm2374_vm1, %v2573_v21  ;;  %v2574_v18 = vpack.c.bf16 %v2081_v35, %v2081_v35  ;;  %v2112_v54 = vmax.f32 %v2048_v6, 0.0  ;;  %v2049_v42 = vadd.f32 %v4249_v29, %v1978_v39 }
 0x2f1   :  { %2399 = vst.msk [vmem:[%s4642_s7 + $0x60] sm:$0xf] %vm2374_vm1, %v2571_v61  ;;  %v2572_v28 = vpack.c.bf16 %v2079_v20, %v2079_v20  ;;  %v2110_v22 = vmax.f32 %v2046_v33, 0.0  ;;  %v2047_v23 = vadd.f32 %v4249_v29, %v1976_v34 }
 0x2f2   :  { %2402 = vst.msk [vmem:[%s4642_s7 + $0x6c] sm:$0xf] %vm2374_vm1, %v2574_v18  ;;  %v2605_v48 = vpack.c.bf16 %v2112_v54, %v2112_v54  ;;  %v2113_v49 = vmax.f32 %v2049_v42, 0.0 }
 0x2f3   :  { %2400 = vst.msk [vmem:[%s4642_s7 + $0x64] sm:$0xf] %vm2374_vm1, %v2572_v28  ;;  %v2603_v14 = vpack.c.bf16 %v2110_v22, %v2110_v22  ;;  %v2111_v63 = vmax.f32 %v2047_v23, 0.0 }
 0x2f4   :  { %2433 = vst.msk [vmem:[%s4642_s7 + $0xe8] sm:$0xf] %vm2374_vm1, %v2605_v48  ;;  %v2606_v10 = vpack.c.bf16 %v2113_v49, %v2113_v49 }
 0x2f5   :  { %2431 = vst.msk [vmem:[%s4642_s7 + $0xe0] sm:$0xf] %vm2374_vm1, %v2603_v14  ;;  %v2604_v0 = vpack.c.bf16 %v2111_v63, %v2111_v63 }
 0x2f6   :  { %2434 = vst.msk [vmem:[%s4642_s7 + $0xec] sm:$0xf] %vm2374_vm1, %v2606_v10 }
 0x2f7   :  { %2432 = vst.msk [vmem:[%s4642_s7 + $0xe4] sm:$0xf] %vm2374_vm1, %v2604_v0 }
 0x305   :  { %v2685_v62 = vpop.f32.mrb[28].mxu0 }
 0x306   :  { %v1949_v58 = vmul.f32 %v2685_v62, %v4244_v53  ;;  %v1769_v46 = vpop.f32.mrb[29].mxu0 }
 0x307   :  { %v1947_v19 = vmul.f32 %v4244_v53, %v1769_v46  ;;  %v2686_v57 = vpop.f32.mrb[30].mxu0 }
 0x308   :  { %v2020_v15 = vadd.f32 %v4249_v29, %v1949_v58  ;;  %v1950_v17 = vmul.f32 %v2686_v57, %v4244_v53  ;;  %v1772_v51 = vpop.f32.mrb[31].mxu0 }
 0x309   :  { %v2018_v31 = vadd.f32 %v4249_v29, %v1947_v19  ;;  %v1948_v55 = vmul.f32 %v4244_v53, %v1772_v51  ;;  %v2717_v36 = vpop.f32.mrb[28].mxu1 }
 0x30a   :  { %v2084_v52 = vmax.f32 %v2020_v15, 0.0  ;;  %v2021_v8 = vadd.f32 %v4249_v29, %v1950_v17  ;;  %v1981_v3 = vmul.f32 %v2717_v36, %v4244_v53  ;;  %v1897_v50 = vpop.f32.mrb[29].mxu1 }
 0x30b   :  { %v2082_v7 = vmax.f32 %v2018_v31, 0.0  ;;  %v2019_v27 = vadd.f32 %v4249_v29, %v1948_v55  ;;  %v1979_v45 = vmul.f32 %v4244_v53, %v1897_v50  ;;  %v2718_v59 = vpop.f32.mrb[30].mxu1 }
 0x30c   :  { %v2577_v13 = vpack.c.bf16 %v2084_v52, %v2084_v52  ;;  %v2085_v41 = vmax.f32 %v2021_v8, 0.0  ;;  %v2052_v60 = vadd.f32 %v4249_v29, %v1981_v3  ;;  %v1982_v44 = vmul.f32 %v2718_v59, %v4244_v53  ;;  %v1900_v26 = vpop.f32.mrb[31].mxu1 }
 0x30d   :  { %v2575_v24 = vpack.c.bf16 %v2082_v7, %v2082_v7  ;;  %v2083_v47 = vmax.f32 %v2019_v27, 0.0  ;;  %v2050_v5 = vadd.f32 %v4249_v29, %v1979_v45  ;;  %v1980_v43 = vmul.f32 %v4244_v53, %v1900_v26 }
 0x30e   :  { %2405 = vst.msk [vmem:[%s4642_s7 + $0x78] sm:$0xf] %vm2374_vm1, %v2577_v13  ;;  %v2578_v11 = vpack.c.bf16 %v2085_v41, %v2085_v41  ;;  %v2116_v38 = vmax.f32 %v2052_v60, 0.0  ;;  %v2053_v37 = vadd.f32 %v4249_v29, %v1982_v44 }
 0x30f   :  { %2403 = vst.msk [vmem:[%s4642_s7 + $0x70] sm:$0xf] %vm2374_vm1, %v2575_v24  ;;  %v2576_v16 = vpack.c.bf16 %v2083_v47, %v2083_v47  ;;  %v2114_v1 = vmax.f32 %v2050_v5, 0.0  ;;  %v2051_v56 = vadd.f32 %v4249_v29, %v1980_v43 }
 0x310   :  { %2406 = vst.msk [vmem:[%s4642_s7 + $0x7c] sm:$0xf] %vm2374_vm1, %v2578_v11  ;;  %v2609_v53 = vpack.c.bf16 %v2116_v38, %v2116_v38  ;;  %v2117_v40 = vmax.f32 %v2053_v37, 0.0 }
 0x311   :  { %2404 = vst.msk [vmem:[%s4642_s7 + $0x74] sm:$0xf] %vm2374_vm1, %v2576_v16  ;;  %v2607_v4 = vpack.c.bf16 %v2114_v1, %v2114_v1  ;;  %v2115_v30 = vmax.f32 %v2051_v56, 0.0 }
 0x312   :  { %2437 = vst.msk [vmem:[%s4642_s7 + $0xf8] sm:$0xf] %vm2374_vm1, %v2609_v53  ;;  %v2610_v29 = vpack.c.bf16 %v2117_v40, %v2117_v40 }
 0x313   :  { %2435 = vst.msk [vmem:[%s4642_s7 + $0xf0] sm:$0xf] %vm2374_vm1, %v2607_v4  ;;  %v2608_v32 = vpack.c.bf16 %v2115_v30, %v2115_v30 }
 0x314   :  { %2438 = vst.msk [vmem:[%s4642_s7 + $0xfc] sm:$0xf] %vm2374_vm1, %v2610_v29 }
 0x315   :  { %2436 = vst.msk [vmem:[%s4642_s7 + $0xf4] sm:$0xf] %vm2374_vm1, %v2608_v32 }

</bundles_post_ra>
